<compile_context>
chip_gen: v7x
topology: tpu7x:2x2x1
jax: 0.10.0
libtpu: 0.0.40
codegen_flags: <defaults>
</compile_context>

<pallas_src>
from functools import partial

import jax
import jax.numpy as jnp
from jax.experimental import pallas as pl
from jax.experimental.pallas import tpu as pltpu

VMEM = pltpu.MemorySpace.VMEM
SMEM = pltpu.MemorySpace.SMEM
BF16 = jnp.bfloat16


def _layernorm(y, g, b, eps=1e-5):
    mu = jnp.mean(y, axis=-1, keepdims=True)
    var = jnp.mean((y - mu) ** 2, axis=-1, keepdims=True)
    return (y - mu) * jax.lax.rsqrt(var + eps) * g + b


# ---------------------------------------------------------------------------
# Host-side banded matrix builders (run once per call, outside the kernel)
# ---------------------------------------------------------------------------
def _same_conv_matrix_host(w, seg, n):
    """(n, n) matrix C with (x @ C)[t] == Conv1d(x, w, padding=(seg-1)//2)[t]."""
    pad = (seg - 1) // 2
    s = jnp.arange(n)[:, None]
    t = jnp.arange(n)[None, :]
    c = jnp.zeros((n, n), jnp.float32)
    for j in range(seg):                               # j = s - t + pad
        c = c + jnp.where(s - t + pad == j, w[j], 0.0)
    return c


def _pad_dilated_conv_matrix_host(w, k, nums, D, L):
    """(D, L) matrix A folding ReplicationPad1d((0, L-D)) followed by
    Conv1d(kernel=k, dilation=nums, padding=nums*(k-1)//2):
    (xcat @ A)[t] == conv1(rep_pad(xcat))[t]."""
    p1 = nums * (k - 1) // 2
    s = jnp.arange(D)[:, None]                         # xcat index
    t = jnp.arange(L)[None, :]                         # output index
    a = jnp.zeros((D, L), jnp.float32)
    for j in range(k):
        q = t + j * nums - p1                          # idx into rep-padded seq
        valid = (q >= 0) & (q < L)                     # zero padding of conv
        src = jnp.minimum(q, D - 1)                    # replication pad (right)
        a = a + jnp.where(valid & (s == src), w[j], 0.0)
    return a


def _strided_conv_matrix_host(w, nums, L, length):
    """(L, length) matrix S with (y @ S)[t'] == Conv1d(y, w, stride=nums)[t']."""
    s = jnp.arange(L)[:, None]
    t = jnp.arange(length)[None, :]
    mtx = jnp.zeros((L, length), jnp.float32)
    for j in range(nums):                              # j = s - t'*nums
        mtx = mtx + jnp.where(s - t * nums == j, w[j], 0.0)
    return mtx


# ---------------------------------------------------------------------------
# Host-side parameter preprocessing
# ---------------------------------------------------------------------------
def _prepare(params, cfg):
    T, P, H, k = cfg['seq_len'], cfg['pred_len'], cfg['d_hid'], cfg['k']
    D = T + P
    segs, lengths = cfg['seg_len'], cfg['sample_len']
    S, J = len(segs), len(lengths)

    nums_list, L_list = [], []
    for length in lengths:
        nums = D // length + (1 if D % length else 0)
        # dilated-conv output length == L only if nums*(k-1) is even
        assert (nums * (k - 1)) % 2 == 0, "conv1 output length mismatch"
        nums_list.append(nums)
        L_list.append(nums * length)
    sumL = sum(L_list)

    wx_blocks, ax_blocks = [], []
    tp_p, ae_p, cs_p = [], [], []
    for i, seg in enumerate(segs):
        assert seg % 2 == 1, "seg_len must be odd for 'same' conv output length"
        tp = params['tp'][i]
        wx_blocks.append(_same_conv_matrix_host(tp['wc'], seg, T))
        tp_p.append(dict(bc=tp['bc'],
                         w1=tp['w1'].astype(BF16), b1=tp['b1'],
                         w2=tp['w2'].astype(BF16), b2=tp['b2'],
                         g=tp['g'], be=tp['be']))

    for i in range(S):
        cs = params['cs'][i]
        ae_blocks, samples, ax_i = [], [], []
        for j, length in enumerate(lengths):
            nums, L = nums_list[j], L_list[j]
            sp = cs['single'][j]
            pj = cs['proj'][j]
            a_full = _pad_dilated_conv_matrix_host(sp['w1c'], k, nums, D, L)
            ax_i.append(a_full[:T])                    # applied to xn
            ae_blocks.append(a_full[T:])               # applied to enc_out
            s2 = _strided_conv_matrix_host(sp['w2c'], nums, L, length)
            samples.append(dict(b1c=sp['b1c'], b2c=sp['b2c'],
                                s2=s2.astype(BF16),
                                w1=pj['w1'].astype(BF16), b1=pj['b1'],
                                w2=pj['w2'].astype(BF16), b2=pj['b2']))
        ax_blocks.append(ax_i)
        ae_p.append(jnp.concatenate(ae_blocks, axis=1).astype(BF16))  # (P, sumL)
        cs_p.append(dict(ln_g=cs['ln_g'], ln_b=cs['ln_b'], samples=samples))

    # One wide RHS for xn: [c1_0..c1_{S-1} | a_x(0,0)..a_x(S-1,J-1)]
    Wx = jnp.concatenate(
        wx_blocks + [b for i in range(S) for b in ax_blocks[i]],
        axis=1).astype(BF16)                                        # (T, S*T + S*sumL)

    prep = dict(Wx=Wx, tp=tp_p, ae=ae_p, cs=cs_p,
                merge_w=params['merge']['w'], merge_b=params['merge']['b'],
                fg=params['final_ln']['g'], fb=params['final_ln']['be'])
    meta = dict(T=T, P=P, D=D, S=S, J=J, L_list=tuple(L_list), sumL=sumL, H=H)
    return prep, meta


# ---------------------------------------------------------------------------
# Fused forward kernel
# ---------------------------------------------------------------------------
def _fused_kernel(meta, treedef, n_leaves, x_ref, *rest):
    out_ref = rest[n_leaves]
    p = jax.tree_util.tree_unflatten(treedef, rest[:n_leaves])

    T, P, D = meta['T'], meta['P'], meta['D']
    S, J = meta['S'], meta['J']
    L_list, sumL = meta['L_list'], meta['sumL']
    M = S * J
    Rb = x_ref.shape[0]
    Pp = out_ref.shape[1]

    # ---- instance normalization per row (time axis, unbiased=False) --------
    x = x_ref[...]
    mu = jnp.mean(x, axis=-1, keepdims=True)
    xc = x - mu
    var = jnp.mean(xc * xc, axis=-1, keepdims=True)
    inv = jax.lax.rsqrt(var + 1e-5)                    # EUP, not VALU divide
    xn = xc * inv
    sd = (var + 1e-5) * inv                            # == sqrt(var + 1e-5)

    # ---- one wide matmul for every xn-consumer (all convs on xn) -----------
    xn_b = xn.astype(BF16)
    wide = jnp.dot(xn_b, p['Wx'][...], preferred_element_type=jnp.float32)

    # Running merge accumulators (Conv2d [3,M]) — no full branch list kept.
    acc0 = jnp.zeros((Rb, D), jnp.float32)
    acc1 = jnp.zeros((Rb, D), jnp.float32)
    acc2 = jnp.zeros((Rb, D), jnp.float32)
    wm = p['merge_w']                                  # SMEM, flat (3*M,)

    for i in range(S):
        tp = p['tp'][i]
        # --- TokenProjection: conv + tanh + MLP(T->H->P) + LayerNorm(P) -----
        h = jnp.tanh(wide[:, i * T:(i + 1) * T] + tp['bc'][0])
        h1 = jnp.dot(h.astype(BF16), tp['w1'][...],
                     preferred_element_type=jnp.float32) + tp['b1'][...]
        h1 = jnp.where(h1 > 0, h1, 0.01 * h1)          # LeakyReLU
        y = jnp.dot(h1.astype(BF16), tp['w2'][...],
                    preferred_element_type=jnp.float32) + tp['b2'][...]
        enc = _layernorm(y, tp['g'][...], tp['be'][...])          # (Rb, P)

        # --- enc_out against one concatenated [a_e(i,0)..a_e(i,J-1)] --------
        enc_wide = jnp.dot(enc.astype(BF16), p['ae'][i][...],
                           preferred_element_type=jnp.float32)    # (Rb, sumL)

        cs = p['cs'][i]
        ln_g = cs['ln_g'][...]
        ln_b = cs['ln_b'][...]
        offL = 0
        for j in range(J):
            L = L_list[j]
            sp = cs['samples'][j]
            x_off = S * T + i * sumL + offL
            y1 = jnp.tanh(wide[:, x_off:x_off + L]
                          + enc_wide[:, offL:offL + L] + sp['b1c'][0])
            y2 = jnp.tanh(jnp.dot(y1.astype(BF16), sp['s2'][...],
                                  preferred_element_type=jnp.float32)
                          + sp['b2c'][0])                          # (Rb, len_j)
            hh = jnp.dot(y2.astype(BF16), sp['w1'][...],
                         preferred_element_type=jnp.float32) + sp['b1'][...]
            hh = jnp.where(hh > 0, hh, 0.01 * hh)
            yb = jnp.dot(hh.astype(BF16), sp['w2'][...],
                         preferred_element_type=jnp.float32) + sp['b2'][...]
            yb = _layernorm(yb, ln_g, ln_b)                        # (Rb, D)

            m = i * J + j
            acc0 = acc0 + wm[0 * M + m] * yb
            acc1 = acc1 + wm[1 * M + m] * yb
            acc2 = acc2 + wm[2 * M + m] * yb
            offL += L

    # ---- merge Conv2d(1,1,[3,M],padding=[1,0]): out[d] = b + acc1[d]
    #      + acc0[d-1] + acc2[d+1]  (zero-padded shift via slice + pad) ------
    zcol = jnp.zeros((Rb, 1), jnp.float32)
    left = jnp.concatenate([zcol, acc0[:, :D - 1]], axis=-1)
    right = jnp.concatenate([acc2[:, 1:], zcol], axis=-1)
    merged = acc1 + left + right + p['merge_b'][0]

    dec = _layernorm(merged, p['fg'][...], p['fb'][...])
    out_p = dec[:, T:] * sd + mu                        # de-norm, last P only
    if Pp > P:                                          # lane-dense store
        out_p = jnp.concatenate(
            [out_p, jnp.zeros((Rb, Pp - P), jnp.float32)], axis=-1)
    out_ref[...] = out_p


# ---------------------------------------------------------------------------
# Wrapper
# ---------------------------------------------------------------------------
def _pick_row_block(R):
    # Prefer a divisor of R that is a multiple of 8, <=512, and gives >=2 grid
    # steps (so v7x's 2 TCs can split the "parallel" axis).
    for blk in (512, 256, 128, 64, 32, 16, 8):
        if R % blk == 0 and 2 * blk <= R:
            return blk
    for blk in (512, 256, 128, 64, 32, 16, 8):
        if R % blk == 0:
            return blk
    return R


def model_forward(params, cfg, x_enc, x_mark_enc=None, x_dec=None, x_mark_dec=None):
    # x_mark_enc / x_dec / x_mark_dec are unused by the reference forward.
    B, T, N = x_enc.shape
    assert T == cfg['seq_len']
    P = cfg['pred_len']
    D = T + P
    R = B * N
    x = jnp.transpose(x_enc, (0, 2, 1)).reshape(R, T).astype(jnp.float32)

    prep, meta = _prepare(params, cfg)
    leaves, treedef = jax.tree_util.tree_flatten(prep)
    n_leaves = len(leaves)

    def leaf_spec(leaf):
        # 1-D scalars/taps -> SMEM (element-wise scalar reads); matrices -> VMEM.
        return pl.BlockSpec(memory_space=SMEM if leaf.ndim <= 1 else VMEM)

    blk = _pick_row_block(R)
    grid = (R // blk,)
    Pp = ((P + 127) // 128) * 128                      # lane-dense output width

    # VMEM budget from actual buffer math (live intermediates + 2x-buffered IO).
    Wx_w = prep['Wx'].shape[1]
    per_row = 4 * (2 * T + Wx_w + meta['sumL'] + 6 * D
                   + max(meta['L_list']) + 2 * meta['H'] + Pp)
    est = 2 * blk * per_row + 2 * 4 * blk * (T + Pp)
    try:
        cap = getattr(pltpu.get_tpu_info(), 'vmem_capacity_bytes', 64 * 2 ** 20)
    except Exception:  # pragma: no cover - defensive
        cap = 64 * 2 ** 20
    vmem_limit = int(min(int(cap * 0.75), max(32 * 2 ** 20, est)))

    kern = partial(_fused_kernel, meta, treedef, n_leaves)
    out = pl.pallas_call(
        kern,
        grid=grid,
        out_shape=jax.ShapeDtypeStruct((R, Pp), jnp.float32),
        in_specs=[pl.BlockSpec((blk, T), lambda r: (r, 0))]
                 + [leaf_spec(l) for l in leaves],
        out_specs=pl.BlockSpec((blk, Pp), lambda r: (r, 0)),
        compiler_params=pltpu.CompilerParams(
            dimension_semantics=("parallel",),          # megacore on v7x
            vmem_limit_bytes=vmem_limit),
    )(x, *leaves)

    out = out[:, :P].reshape(B, N, P)
    return jnp.transpose(out, (0, 2, 1))               # (B, P, N)


# ---------------------------------------------------------------------------
# Deterministic synthetic parameters (match the nn.Module shapes)
# ---------------------------------------------------------------------------
def init_params(key, cfg):
    T, P, H, k = cfg['seq_len'], cfg['pred_len'], cfg['d_hid'], cfg['k']
    D = T + P
    keys = iter(jax.random.split(key, 256))

    def nrm(shape, scale=0.1):
        return (scale * jax.random.normal(next(keys), shape)).astype(jnp.float32)

    tp = []
    for seg in cfg['seg_len']:
        tp.append(dict(wc=nrm((seg,)), bc=nrm((1,)),
                       w1=nrm((T, H)), b1=nrm((1, H)),
                       w2=nrm((H, P)), b2=nrm((1, P)),
                       g=jnp.ones((1, P), jnp.float32),
                       be=jnp.zeros((1, P), jnp.float32)))

    cs = []
    for _ in cfg['seg_len']:
        single, proj = [], []
        for length in cfg['sample_len']:
            nums = D // length + (1 if D % length else 0)
            single.append(dict(w1c=nrm((k,)), b1c=nrm((1,)),
                               w2c=nrm((nums,)), b2c=nrm((1,))))
            proj.append(dict(w1=nrm((length, H)), b1=nrm((1, H)),
                             w2=nrm((H, D)), b2=nrm((1, D))))
        cs.append(dict(single=single, proj=proj,
                       ln_g=jnp.ones((1, D), jnp.float32),
                       ln_b=jnp.zeros((1, D), jnp.float32)))

    M = len(cfg['seg_len']) * len(cfg['sample_len'])
    # merge Conv2d weight (1,1,3,M) flattened as w[dt*M + m]
    merge_p = dict(w=nrm((3 * M,)), b=nrm((1,)))
    final_ln = dict(g=jnp.ones((1, D), jnp.float32),
                    be=jnp.zeros((1, D), jnp.float32))
    return dict(tp=tp, cs=cs, merge=merge_p, final_ln=final_ln)


if __name__ == "__main__":
    cfg = dict(task_name='long_term_forecast',
               seq_len=16, pred_len=8,
               seg_len=[3, 5], sample_len=[4, 5],
               k=3, d_hid=32)

    key = jax.random.PRNGKey(0)
    kp, kx = jax.random.split(key)
    params = init_params(kp, cfg)

    B, N = 2, 4
    x_enc = jax.random.normal(kx, (B, cfg['seq_len'], N), dtype=jnp.float32)
    x_mark_enc = jnp.zeros((B, cfg['seq_len'], 4), jnp.float32)   # unused
    x_dec = jnp.zeros((B, cfg['pred_len'], N), jnp.float32)       # unused
    x_mark_dec = jnp.zeros((B, cfg['pred_len'], 4), jnp.float32)  # unused

    out = model_forward(params, cfg, x_enc, x_mark_enc, x_dec, x_mark_dec)
    jax.block_until_ready(out)
    assert out.shape == (B, cfg['pred_len'], N), out.shape
    print("KERNEL_OK")
</pallas_src>

<mosaic_0001>
module attributes {stable_mosaic.version = 11 : i64} {
  func.func @_fused_kernel(%arg0: i32, %arg1: memref<8x16xf32, #tpu.memory_space<vmem>>, %arg2: memref<16x130xbf16, #tpu.memory_space<vmem>>, %arg3: memref<8x49xbf16, #tpu.memory_space<vmem>>, %arg4: memref<8x49xbf16, #tpu.memory_space<vmem>>, %arg5: memref<1x24xf32, #tpu.memory_space<vmem>>, %arg6: memref<1x24xf32, #tpu.memory_space<vmem>>, %arg7: memref<1x32xf32, #tpu.memory_space<vmem>>, %arg8: memref<1xf32, #tpu.memory_space<smem>>, %arg9: memref<1x24xf32, #tpu.memory_space<vmem>>, %arg10: memref<1xf32, #tpu.memory_space<smem>>, %arg11: memref<24x4xbf16, #tpu.memory_space<vmem>>, %arg12: memref<4x32xbf16, #tpu.memory_space<vmem>>, %arg13: memref<32x24xbf16, #tpu.memory_space<vmem>>, %arg14: memref<1x32xf32, #tpu.memory_space<vmem>>, %arg15: memref<1xf32, #tpu.memory_space<smem>>, %arg16: memref<1x24xf32, #tpu.memory_space<vmem>>, %arg17: memref<1xf32, #tpu.memory_space<smem>>, %arg18: memref<25x5xbf16, #tpu.memory_space<vmem>>, %arg19: memref<5x32xbf16, #tpu.memory_space<vmem>>, %arg20: memref<32x24xbf16, #tpu.memory_space<vmem>>, %arg21: memref<1x24xf32, #tpu.memory_space<vmem>>, %arg22: memref<1x24xf32, #tpu.memory_space<vmem>>, %arg23: memref<1x32xf32, #tpu.memory_space<vmem>>, %arg24: memref<1xf32, #tpu.memory_space<smem>>, %arg25: memref<1x24xf32, #tpu.memory_space<vmem>>, %arg26: memref<1xf32, #tpu.memory_space<smem>>, %arg27: memref<24x4xbf16, #tpu.memory_space<vmem>>, %arg28: memref<4x32xbf16, #tpu.memory_space<vmem>>, %arg29: memref<32x24xbf16, #tpu.memory_space<vmem>>, %arg30: memref<1x32xf32, #tpu.memory_space<vmem>>, %arg31: memref<1xf32, #tpu.memory_space<smem>>, %arg32: memref<1x24xf32, #tpu.memory_space<vmem>>, %arg33: memref<1xf32, #tpu.memory_space<smem>>, %arg34: memref<25x5xbf16, #tpu.memory_space<vmem>>, %arg35: memref<5x32xbf16, #tpu.memory_space<vmem>>, %arg36: memref<32x24xbf16, #tpu.memory_space<vmem>>, %arg37: memref<1x24xf32, #tpu.memory_space<vmem>>, %arg38: memref<1x24xf32, #tpu.memory_space<vmem>>, %arg39: memref<1xf32, #tpu.memory_space<smem>>, %arg40: memref<12xf32, #tpu.memory_space<smem>>, %arg41: memref<1x32xf32, #tpu.memory_space<vmem>>, %arg42: memref<1x8xf32, #tpu.memory_space<vmem>>, %arg43: memref<1xf32, #tpu.memory_space<smem>>, %arg44: memref<1x8xf32, #tpu.memory_space<vmem>>, %arg45: memref<1x8xf32, #tpu.memory_space<vmem>>, %arg46: memref<16x32xbf16, #tpu.memory_space<vmem>>, %arg47: memref<32x8xbf16, #tpu.memory_space<vmem>>, %arg48: memref<1x32xf32, #tpu.memory_space<vmem>>, %arg49: memref<1x8xf32, #tpu.memory_space<vmem>>, %arg50: memref<1xf32, #tpu.memory_space<smem>>, %arg51: memref<1x8xf32, #tpu.memory_space<vmem>>, %arg52: memref<1x8xf32, #tpu.memory_space<vmem>>, %arg53: memref<16x32xbf16, #tpu.memory_space<vmem>>, %arg54: memref<32x8xbf16, #tpu.memory_space<vmem>>, %arg55: memref<8x128xf32, #tpu.memory_space<vmem>>) attributes {dimension_semantics = [#tpu.dimension_semantics<parallel>], iteration_bounds = array<i64: 1>, scalar_prefetch = 0 : i64, scratch_operands = 0 : i64, tpu.core_type = #tpu.core_type<tc>, window_params = [{transform_indices = @transform_0, window_bounds = array<i64: 8, 16>}, {pipeline_mode = #tpu.pipeline_mode<synchronous>, transform_indices = @transform_1, window_bounds = array<i64: 16, 130>}, {pipeline_mode = #tpu.pipeline_mode<synchronous>, transform_indices = @transform_2, window_bounds = array<i64: 8, 49>}, {pipeline_mode = #tpu.pipeline_mode<synchronous>, transform_indices = @transform_3, window_bounds = array<i64: 8, 49>}, {pipeline_mode = #tpu.pipeline_mode<synchronous>, transform_indices = @transform_4, window_bounds = array<i64: 1, 24>}, {pipeline_mode = #tpu.pipeline_mode<synchronous>, transform_indices = @transform_5, window_bounds = array<i64: 1, 24>}, {pipeline_mode = #tpu.pipeline_mode<synchronous>, transform_indices = @transform_6, window_bounds = array<i64: 1, 32>}, {transform_indices = @transform_7, window_bounds = array<i64: 1>}, {pipeline_mode = #tpu.pipeline_mode<synchronous>, transform_indices = @transform_8, window_bounds = array<i64: 1, 24>}, {transform_indices = @transform_9, window_bounds = array<i64: 1>}, {pipeline_mode = #tpu.pipeline_mode<synchronous>, transform_indices = @transform_10, window_bounds = array<i64: 24, 4>}, {pipeline_mode = #tpu.pipeline_mode<synchronous>, transform_indices = @transform_11, window_bounds = array<i64: 4, 32>}, {pipeline_mode = #tpu.pipeline_mode<synchronous>, transform_indices = @transform_12, window_bounds = array<i64: 32, 24>}, {pipeline_mode = #tpu.pipeline_mode<synchronous>, transform_indices = @transform_13, window_bounds = array<i64: 1, 32>}, {transform_indices = @transform_14, window_bounds = array<i64: 1>}, {pipeline_mode = #tpu.pipeline_mode<synchronous>, transform_indices = @transform_15, window_bounds = array<i64: 1, 24>}, {transform_indices = @transform_16, window_bounds = array<i64: 1>}, {pipeline_mode = #tpu.pipeline_mode<synchronous>, transform_indices = @transform_17, window_bounds = array<i64: 25, 5>}, {pipeline_mode = #tpu.pipeline_mode<synchronous>, transform_indices = @transform_18, window_bounds = array<i64: 5, 32>}, {pipeline_mode = #tpu.pipeline_mode<synchronous>, transform_indices = @transform_19, window_bounds = array<i64: 32, 24>}, {pipeline_mode = #tpu.pipeline_mode<synchronous>, transform_indices = @transform_20, window_bounds = array<i64: 1, 24>}, {pipeline_mode = #tpu.pipeline_mode<synchronous>, transform_indices = @transform_21, window_bounds = array<i64: 1, 24>}, {pipeline_mode = #tpu.pipeline_mode<synchronous>, transform_indices = @transform_22, window_bounds = array<i64: 1, 32>}, {transform_indices = @transform_23, window_bounds = array<i64: 1>}, {pipeline_mode = #tpu.pipeline_mode<synchronous>, transform_indices = @transform_24, window_bounds = array<i64: 1, 24>}, {transform_indices = @transform_25, window_bounds = array<i64: 1>}, {pipeline_mode = #tpu.pipeline_mode<synchronous>, transform_indices = @transform_26, window_bounds = array<i64: 24, 4>}, {pipeline_mode = #tpu.pipeline_mode<synchronous>, transform_indices = @transform_27, window_bounds = array<i64: 4, 32>}, {pipeline_mode = #tpu.pipeline_mode<synchronous>, transform_indices = @transform_28, window_bounds = array<i64: 32, 24>}, {pipeline_mode = #tpu.pipeline_mode<synchronous>, transform_indices = @transform_29, window_bounds = array<i64: 1, 32>}, {transform_indices = @transform_30, window_bounds = array<i64: 1>}, {pipeline_mode = #tpu.pipeline_mode<synchronous>, transform_indices = @transform_31, window_bounds = array<i64: 1, 24>}, {transform_indices = @transform_32, window_bounds = array<i64: 1>}, {pipeline_mode = #tpu.pipeline_mode<synchronous>, transform_indices = @transform_33, window_bounds = array<i64: 25, 5>}, {pipeline_mode = #tpu.pipeline_mode<synchronous>, transform_indices = @transform_34, window_bounds = array<i64: 5, 32>}, {pipeline_mode = #tpu.pipeline_mode<synchronous>, transform_indices = @transform_35, window_bounds = array<i64: 32, 24>}, {pipeline_mode = #tpu.pipeline_mode<synchronous>, transform_indices = @transform_36, window_bounds = array<i64: 1, 24>}, {pipeline_mode = #tpu.pipeline_mode<synchronous>, transform_indices = @transform_37, window_bounds = array<i64: 1, 24>}, {transform_indices = @transform_38, window_bounds = array<i64: 1>}, {transform_indices = @transform_39, window_bounds = array<i64: 12>}, {pipeline_mode = #tpu.pipeline_mode<synchronous>, transform_indices = @transform_40, window_bounds = array<i64: 1, 32>}, {pipeline_mode = #tpu.pipeline_mode<synchronous>, transform_indices = @transform_41, window_bounds = array<i64: 1, 8>}, {transform_indices = @transform_42, window_bounds = array<i64: 1>}, {pipeline_mode = #tpu.pipeline_mode<synchronous>, transform_indices = @transform_43, window_bounds = array<i64: 1, 8>}, {pipeline_mode = #tpu.pipeline_mode<synchronous>, transform_indices = @transform_44, window_bounds = array<i64: 1, 8>}, {pipeline_mode = #tpu.pipeline_mode<synchronous>, transform_indices = @transform_45, window_bounds = array<i64: 16, 32>}, {pipeline_mode = #tpu.pipeline_mode<synchronous>, transform_indices = @transform_46, window_bounds = array<i64: 32, 8>}, {pipeline_mode = #tpu.pipeline_mode<synchronous>, transform_indices = @transform_47, window_bounds = array<i64: 1, 32>}, {pipeline_mode = #tpu.pipeline_mode<synchronous>, transform_indices = @transform_48, window_bounds = array<i64: 1, 8>}, {transform_indices = @transform_49, window_bounds = array<i64: 1>}, {pipeline_mode = #tpu.pipeline_mode<synchronous>, transform_indices = @transform_50, window_bounds = array<i64: 1, 8>}, {pipeline_mode = #tpu.pipeline_mode<synchronous>, transform_indices = @transform_51, window_bounds = array<i64: 1, 8>}, {pipeline_mode = #tpu.pipeline_mode<synchronous>, transform_indices = @transform_52, window_bounds = array<i64: 16, 32>}, {pipeline_mode = #tpu.pipeline_mode<synchronous>, transform_indices = @transform_53, window_bounds = array<i64: 32, 8>}, {transform_indices = @transform_54, window_bounds = array<i64: 8, 128>}]} {
    %c0 = arith.constant 0 : index
    %c0_0 = arith.constant 0 : index
    %0 = vector.load %arg1[%c0, %c0_0] : memref<8x16xf32, #tpu.memory_space<vmem>>, vector<8x16xf32>
    %cst = arith.constant dense<0.000000e+00> : vector<8xf32>
    %1 = vector.multi_reduction <add>, %0, %cst [1] : vector<8x16xf32> to vector<8xf32>
    %2 = vector.shape_cast %1 : vector<8xf32> to vector<8x1xf32>
    %cst_1 = arith.constant 1.600000e+01 : f32
    %3 = vector.broadcast %cst_1 : f32 to vector<8x1xf32>
    %4 = arith.divf %2, %3 : vector<8x1xf32>
    %5 = vector.broadcast %4 : vector<8x1xf32> to vector<8x16xf32>
    %6 = arith.subf %0, %5 : vector<8x16xf32>
    %7 = arith.mulf %6, %6 : vector<8x16xf32>
    %cst_2 = arith.constant dense<0.000000e+00> : vector<8xf32>
    %8 = vector.multi_reduction <add>, %7, %cst_2 [1] : vector<8x16xf32> to vector<8xf32>
    %9 = vector.shape_cast %8 : vector<8xf32> to vector<8x1xf32>
    %cst_3 = arith.constant 1.600000e+01 : f32
    %10 = vector.broadcast %cst_3 : f32 to vector<8x1xf32>
    %11 = arith.divf %9, %10 : vector<8x1xf32>
    %cst_4 = arith.constant 9.99999974E-6 : f32
    %12 = vector.broadcast %cst_4 : f32 to vector<8x1xf32>
    %13 = arith.addf %11, %12 : vector<8x1xf32>
    %14 = math.rsqrt %13 : vector<8x1xf32>
    %15 = vector.broadcast %14 : vector<8x1xf32> to vector<8x16xf32>
    %16 = arith.mulf %6, %15 : vector<8x16xf32>
    %cst_5 = arith.constant 9.99999974E-6 : f32
    %17 = vector.broadcast %cst_5 : f32 to vector<8x1xf32>
    %18 = arith.addf %11, %17 : vector<8x1xf32>
    %19 = arith.mulf %18, %14 : vector<8x1xf32>
    %20 = arith.truncf %16 : vector<8x16xf32> to vector<8x16xbf16>
    %c0_6 = arith.constant 0 : index
    %c0_7 = arith.constant 0 : index
    %21 = vector.load %arg2[%c0_6, %c0_7] : memref<16x130xbf16, #tpu.memory_space<vmem>>, vector<16x130xbf16>
    %cst_8 = arith.constant dense<0.000000e+00> : vector<8x130xf32>
    %22 = tpu.matmul %20, %21, %cst_8 {dimension_numbers = #tpu.dot_dimension_numbers<[1], [0], [0], [1], [0, 0, 1, 1], [], []>} : vector<8x16xbf16>, vector<16x130xbf16>, vector<8x130xf32> -> vector<8x130xf32>
    %cst_9 = arith.constant 0.000000e+00 : f32
    %23 = vector.broadcast %cst_9 : f32 to vector<8x24xf32>
    %cst_10 = arith.constant 0.000000e+00 : f32
    %24 = vector.broadcast %cst_10 : f32 to vector<8x24xf32>
    %cst_11 = arith.constant 0.000000e+00 : f32
    %25 = vector.broadcast %cst_11 : f32 to vector<8x24xf32>
    %26 = vector.extract_strided_slice %22 {offsets = [0, 0], sizes = [8, 16], strides = [1, 1]} : vector<8x130xf32> to vector<8x16xf32>
    %c0_12 = arith.constant 0 : index
    %27 = memref.load %arg43[%c0_12] : memref<1xf32, #tpu.memory_space<smem>>
    %28 = vector.broadcast %27 : f32 to vector<8x16xf32>
    %29 = arith.addf %26, %28 : vector<8x16xf32>
    %30 = math.tanh %29 : vector<8x16xf32>
    %31 = arith.truncf %30 : vector<8x16xf32> to vector<8x16xbf16>
    %c0_13 = arith.constant 0 : index
    %c0_14 = arith.constant 0 : index
    %32 = vector.load %arg46[%c0_13, %c0_14] : memref<16x32xbf16, #tpu.memory_space<vmem>>, vector<16x32xbf16>
    %cst_15 = arith.constant dense<0.000000e+00> : vector<8x32xf32>
    %33 = tpu.matmul %31, %32, %cst_15 {dimension_numbers = #tpu.dot_dimension_numbers<[1], [0], [0], [1], [0, 0, 1, 1], [], []>} : vector<8x16xbf16>, vector<16x32xbf16>, vector<8x32xf32> -> vector<8x32xf32>
    %c0_16 = arith.constant 0 : index
    %c0_17 = arith.constant 0 : index
    %34 = vector.load %arg41[%c0_16, %c0_17] : memref<1x32xf32, #tpu.memory_space<vmem>>, vector<1x32xf32>
    %35 = vector.broadcast %34 : vector<1x32xf32> to vector<8x32xf32>
    %36 = arith.addf %33, %35 : vector<8x32xf32>
    %cst_18 = arith.constant 0.000000e+00 : f32
    %37 = vector.broadcast %cst_18 : f32 to vector<8x32xf32>
    %38 = arith.cmpf ogt, %36, %37 : vector<8x32xf32>
    %cst_19 = arith.constant 0.00999999977 : f32
    %39 = vector.broadcast %cst_19 : f32 to vector<8x32xf32>
    %40 = arith.mulf %39, %36 : vector<8x32xf32>
    %41 = arith.select %38, %36, %40 : vector<8x32xi1>, vector<8x32xf32>
    %42 = arith.truncf %41 : vector<8x32xf32> to vector<8x32xbf16>
    %c0_20 = arith.constant 0 : index
    %c0_21 = arith.constant 0 : index
    %43 = vector.load %arg47[%c0_20, %c0_21] : memref<32x8xbf16, #tpu.memory_space<vmem>>, vector<32x8xbf16>
    %cst_22 = arith.constant dense<0.000000e+00> : vector<8x8xf32>
    %44 = tpu.matmul %42, %43, %cst_22 {dimension_numbers = #tpu.dot_dimension_numbers<[1], [0], [0], [1], [0, 0, 1, 1], [], []>} : vector<8x32xbf16>, vector<32x8xbf16>, vector<8x8xf32> -> vector<8x8xf32>
    %c0_23 = arith.constant 0 : index
    %c0_24 = arith.constant 0 : index
    %45 = vector.load %arg42[%c0_23, %c0_24] : memref<1x8xf32, #tpu.memory_space<vmem>>, vector<1x8xf32>
    %46 = vector.broadcast %45 : vector<1x8xf32> to vector<8x8xf32>
    %47 = arith.addf %44, %46 : vector<8x8xf32>
    %c0_25 = arith.constant 0 : index
    %c0_26 = arith.constant 0 : index
    %48 = vector.load %arg45[%c0_25, %c0_26] : memref<1x8xf32, #tpu.memory_space<vmem>>, vector<1x8xf32>
    %c0_27 = arith.constant 0 : index
    %c0_28 = arith.constant 0 : index
    %49 = vector.load %arg44[%c0_27, %c0_28] : memref<1x8xf32, #tpu.memory_space<vmem>>, vector<1x8xf32>
    %cst_29 = arith.constant dense<0.000000e+00> : vector<8xf32>
    %50 = vector.multi_reduction <add>, %47, %cst_29 [1] : vector<8x8xf32> to vector<8xf32>
    %51 = vector.shape_cast %50 : vector<8xf32> to vector<8x1xf32>
    %cst_30 = arith.constant 8.000000e+00 : f32
    %52 = vector.broadcast %cst_30 : f32 to vector<8x1xf32>
    %53 = arith.divf %51, %52 : vector<8x1xf32>
    %54 = vector.broadcast %53 : vector<8x1xf32> to vector<8x8xf32>
    %55 = arith.subf %47, %54 : vector<8x8xf32>
    %56 = arith.mulf %55, %55 : vector<8x8xf32>
    %cst_31 = arith.constant dense<0.000000e+00> : vector<8xf32>
    %57 = vector.multi_reduction <add>, %56, %cst_31 [1] : vector<8x8xf32> to vector<8xf32>
    %58 = vector.shape_cast %57 : vector<8xf32> to vector<8x1xf32>
    %cst_32 = arith.constant 8.000000e+00 : f32
    %59 = vector.broadcast %cst_32 : f32 to vector<8x1xf32>
    %60 = arith.divf %58, %59 : vector<8x1xf32>
    %61 = vector.broadcast %53 : vector<8x1xf32> to vector<8x8xf32>
    %62 = arith.subf %47, %61 : vector<8x8xf32>
    %cst_33 = arith.constant 9.99999974E-6 : f32
    %63 = vector.broadcast %cst_33 : f32 to vector<8x1xf32>
    %64 = arith.addf %60, %63 : vector<8x1xf32>
    %65 = math.rsqrt %64 : vector<8x1xf32>
    %66 = vector.broadcast %65 : vector<8x1xf32> to vector<8x8xf32>
    %67 = arith.mulf %62, %66 : vector<8x8xf32>
    %68 = vector.broadcast %48 : vector<1x8xf32> to vector<8x8xf32>
    %69 = arith.mulf %67, %68 : vector<8x8xf32>
    %70 = vector.broadcast %49 : vector<1x8xf32> to vector<8x8xf32>
    %71 = arith.addf %69, %70 : vector<8x8xf32>
    %72 = arith.truncf %71 : vector<8x8xf32> to vector<8x8xbf16>
    %c0_34 = arith.constant 0 : index
    %c0_35 = arith.constant 0 : index
    %73 = vector.load %arg3[%c0_34, %c0_35] : memref<8x49xbf16, #tpu.memory_space<vmem>>, vector<8x49xbf16>
    %cst_36 = arith.constant dense<0.000000e+00> : vector<8x49xf32>
    %74 = tpu.matmul %72, %73, %cst_36 {dimension_numbers = #tpu.dot_dimension_numbers<[1], [0], [0], [1], [0, 0, 1, 1], [], []>} : vector<8x8xbf16>, vector<8x49xbf16>, vector<8x49xf32> -> vector<8x49xf32>
    %c0_37 = arith.constant 0 : index
    %c0_38 = arith.constant 0 : index
    %75 = vector.load %arg6[%c0_37, %c0_38] : memref<1x24xf32, #tpu.memory_space<vmem>>, vector<1x24xf32>
    %c0_39 = arith.constant 0 : index
    %c0_40 = arith.constant 0 : index
    %76 = vector.load %arg5[%c0_39, %c0_40] : memref<1x24xf32, #tpu.memory_space<vmem>>, vector<1x24xf32>
    %77 = vector.extract_strided_slice %22 {offsets = [0, 32], sizes = [8, 24], strides = [1, 1]} : vector<8x130xf32> to vector<8x24xf32>
    %78 = vector.extract_strided_slice %74 {offsets = [0, 0], sizes = [8, 24], strides = [1, 1]} : vector<8x49xf32> to vector<8x24xf32>
    %79 = arith.addf %77, %78 : vector<8x24xf32>
    %c0_41 = arith.constant 0 : index
    %80 = memref.load %arg8[%c0_41] : memref<1xf32, #tpu.memory_space<smem>>
    %81 = vector.broadcast %80 : f32 to vector<8x24xf32>
    %82 = arith.addf %79, %81 : vector<8x24xf32>
    %83 = math.tanh %82 : vector<8x24xf32>
    %84 = arith.truncf %83 : vector<8x24xf32> to vector<8x24xbf16>
    %c0_42 = arith.constant 0 : index
    %c0_43 = arith.constant 0 : index
    %85 = vector.load %arg11[%c0_42, %c0_43] : memref<24x4xbf16, #tpu.memory_space<vmem>>, vector<24x4xbf16>
    %cst_44 = arith.constant dense<0.000000e+00> : vector<8x4xf32>
    %86 = tpu.matmul %84, %85, %cst_44 {dimension_numbers = #tpu.dot_dimension_numbers<[1], [0], [0], [1], [0, 0, 1, 1], [], []>} : vector<8x24xbf16>, vector<24x4xbf16>, vector<8x4xf32> -> vector<8x4xf32>
    %c0_45 = arith.constant 0 : index
    %87 = memref.load %arg10[%c0_45] : memref<1xf32, #tpu.memory_space<smem>>
    %88 = vector.broadcast %87 : f32 to vector<8x4xf32>
    %89 = arith.addf %86, %88 : vector<8x4xf32>
    %90 = math.tanh %89 : vector<8x4xf32>
    %91 = arith.truncf %90 : vector<8x4xf32> to vector<8x4xbf16>
    %c0_46 = arith.constant 0 : index
    %c0_47 = arith.constant 0 : index
    %92 = vector.load %arg12[%c0_46, %c0_47] : memref<4x32xbf16, #tpu.memory_space<vmem>>, vector<4x32xbf16>
    %cst_48 = arith.constant dense<0.000000e+00> : vector<8x32xf32>
    %93 = tpu.matmul %91, %92, %cst_48 {dimension_numbers = #tpu.dot_dimension_numbers<[1], [0], [0], [1], [0, 0, 1, 1], [], []>} : vector<8x4xbf16>, vector<4x32xbf16>, vector<8x32xf32> -> vector<8x32xf32>
    %c0_49 = arith.constant 0 : index
    %c0_50 = arith.constant 0 : index
    %94 = vector.load %arg7[%c0_49, %c0_50] : memref<1x32xf32, #tpu.memory_space<vmem>>, vector<1x32xf32>
    %95 = vector.broadcast %94 : vector<1x32xf32> to vector<8x32xf32>
    %96 = arith.addf %93, %95 : vector<8x32xf32>
    %cst_51 = arith.constant 0.000000e+00 : f32
    %97 = vector.broadcast %cst_51 : f32 to vector<8x32xf32>
    %98 = arith.cmpf ogt, %96, %97 : vector<8x32xf32>
    %cst_52 = arith.constant 0.00999999977 : f32
    %99 = vector.broadcast %cst_52 : f32 to vector<8x32xf32>
    %100 = arith.mulf %99, %96 : vector<8x32xf32>
    %101 = arith.select %98, %96, %100 : vector<8x32xi1>, vector<8x32xf32>
    %102 = arith.truncf %101 : vector<8x32xf32> to vector<8x32xbf16>
    %c0_53 = arith.constant 0 : index
    %c0_54 = arith.constant 0 : index
    %103 = vector.load %arg13[%c0_53, %c0_54] : memref<32x24xbf16, #tpu.memory_space<vmem>>, vector<32x24xbf16>
    %cst_55 = arith.constant dense<0.000000e+00> : vector<8x24xf32>
    %104 = tpu.matmul %102, %103, %cst_55 {dimension_numbers = #tpu.dot_dimension_numbers<[1], [0], [0], [1], [0, 0, 1, 1], [], []>} : vector<8x32xbf16>, vector<32x24xbf16>, vector<8x24xf32> -> vector<8x24xf32>
    %c0_56 = arith.constant 0 : index
    %c0_57 = arith.constant 0 : index
    %105 = vector.load %arg9[%c0_56, %c0_57] : memref<1x24xf32, #tpu.memory_space<vmem>>, vector<1x24xf32>
    %106 = vector.broadcast %105 : vector<1x24xf32> to vector<8x24xf32>
    %107 = arith.addf %104, %106 : vector<8x24xf32>
    %cst_58 = arith.constant dense<0.000000e+00> : vector<8xf32>
    %108 = vector.multi_reduction <add>, %107, %cst_58 [1] : vector<8x24xf32> to vector<8xf32>
    %109 = vector.shape_cast %108 : vector<8xf32> to vector<8x1xf32>
    %cst_59 = arith.constant 2.400000e+01 : f32
    %110 = vector.broadcast %cst_59 : f32 to vector<8x1xf32>
    %111 = arith.divf %109, %110 : vector<8x1xf32>
    %112 = vector.broadcast %111 : vector<8x1xf32> to vector<8x24xf32>
    %113 = arith.subf %107, %112 : vector<8x24xf32>
    %114 = arith.mulf %113, %113 : vector<8x24xf32>
    %cst_60 = arith.constant dense<0.000000e+00> : vector<8xf32>
    %115 = vector.multi_reduction <add>, %114, %cst_60 [1] : vector<8x24xf32> to vector<8xf32>
    %116 = vector.shape_cast %115 : vector<8xf32> to vector<8x1xf32>
    %cst_61 = arith.constant 2.400000e+01 : f32
    %117 = vector.broadcast %cst_61 : f32 to vector<8x1xf32>
    %118 = arith.divf %116, %117 : vector<8x1xf32>
    %119 = vector.broadcast %111 : vector<8x1xf32> to vector<8x24xf32>
    %120 = arith.subf %107, %119 : vector<8x24xf32>
    %cst_62 = arith.constant 9.99999974E-6 : f32
    %121 = vector.broadcast %cst_62 : f32 to vector<8x1xf32>
    %122 = arith.addf %118, %121 : vector<8x1xf32>
    %123 = math.rsqrt %122 : vector<8x1xf32>
    %124 = vector.broadcast %123 : vector<8x1xf32> to vector<8x24xf32>
    %125 = arith.mulf %120, %124 : vector<8x24xf32>
    %126 = vector.broadcast %75 : vector<1x24xf32> to vector<8x24xf32>
    %127 = arith.mulf %125, %126 : vector<8x24xf32>
    %128 = vector.broadcast %76 : vector<1x24xf32> to vector<8x24xf32>
    %129 = arith.addf %127, %128 : vector<8x24xf32>
    %c0_63 = arith.constant 0 : index
    %130 = memref.load %arg40[%c0_63] : memref<12xf32, #tpu.memory_space<smem>>
    %131 = vector.broadcast %130 : f32 to vector<8x24xf32>
    %132 = arith.mulf %131, %129 : vector<8x24xf32>
    %133 = arith.addf %23, %132 : vector<8x24xf32>
    %c4 = arith.constant 4 : index
    %134 = memref.load %arg40[%c4] : memref<12xf32, #tpu.memory_space<smem>>
    %135 = vector.broadcast %134 : f32 to vector<8x24xf32>
    %136 = arith.mulf %135, %129 : vector<8x24xf32>
    %137 = arith.addf %24, %136 : vector<8x24xf32>
    %c8 = arith.constant 8 : index
    %138 = memref.load %arg40[%c8] : memref<12xf32, #tpu.memory_space<smem>>
    %139 = vector.broadcast %138 : f32 to vector<8x24xf32>
    %140 = arith.mulf %139, %129 : vector<8x24xf32>
    %141 = arith.addf %25, %140 : vector<8x24xf32>
    %142 = vector.extract_strided_slice %22 {offsets = [0, 56], sizes = [8, 25], strides = [1, 1]} : vector<8x130xf32> to vector<8x25xf32>
    %143 = vector.extract_strided_slice %74 {offsets = [0, 24], sizes = [8, 25], strides = [1, 1]} : vector<8x49xf32> to vector<8x25xf32>
    %144 = arith.addf %142, %143 : vector<8x25xf32>
    %c0_64 = arith.constant 0 : index
    %145 = memref.load %arg15[%c0_64] : memref<1xf32, #tpu.memory_space<smem>>
    %146 = vector.broadcast %145 : f32 to vector<8x25xf32>
    %147 = arith.addf %144, %146 : vector<8x25xf32>
    %148 = math.tanh %147 : vector<8x25xf32>
    %149 = arith.truncf %148 : vector<8x25xf32> to vector<8x25xbf16>
    %c0_65 = arith.constant 0 : index
    %c0_66 = arith.constant 0 : index
    %150 = vector.load %arg18[%c0_65, %c0_66] : memref<25x5xbf16, #tpu.memory_space<vmem>>, vector<25x5xbf16>
    %cst_67 = arith.constant dense<0.000000e+00> : vector<8x5xf32>
    %151 = tpu.matmul %149, %150, %cst_67 {dimension_numbers = #tpu.dot_dimension_numbers<[1], [0], [0], [1], [0, 0, 1, 1], [], []>} : vector<8x25xbf16>, vector<25x5xbf16>, vector<8x5xf32> -> vector<8x5xf32>
    %c0_68 = arith.constant 0 : index
    %152 = memref.load %arg17[%c0_68] : memref<1xf32, #tpu.memory_space<smem>>
    %153 = vector.broadcast %152 : f32 to vector<8x5xf32>
    %154 = arith.addf %151, %153 : vector<8x5xf32>
    %155 = math.tanh %154 : vector<8x5xf32>
    %156 = arith.truncf %155 : vector<8x5xf32> to vector<8x5xbf16>
    %c0_69 = arith.constant 0 : index
    %c0_70 = arith.constant 0 : index
    %157 = vector.load %arg19[%c0_69, %c0_70] : memref<5x32xbf16, #tpu.memory_space<vmem>>, vector<5x32xbf16>
    %cst_71 = arith.constant dense<0.000000e+00> : vector<8x32xf32>
    %158 = tpu.matmul %156, %157, %cst_71 {dimension_numbers = #tpu.dot_dimension_numbers<[1], [0], [0], [1], [0, 0, 1, 1], [], []>} : vector<8x5xbf16>, vector<5x32xbf16>, vector<8x32xf32> -> vector<8x32xf32>
    %c0_72 = arith.constant 0 : index
    %c0_73 = arith.constant 0 : index
    %159 = vector.load %arg14[%c0_72, %c0_73] : memref<1x32xf32, #tpu.memory_space<vmem>>, vector<1x32xf32>
    %160 = vector.broadcast %159 : vector<1x32xf32> to vector<8x32xf32>
    %161 = arith.addf %158, %160 : vector<8x32xf32>
    %cst_74 = arith.constant 0.000000e+00 : f32
    %162 = vector.broadcast %cst_74 : f32 to vector<8x32xf32>
    %163 = arith.cmpf ogt, %161, %162 : vector<8x32xf32>
    %cst_75 = arith.constant 0.00999999977 : f32
    %164 = vector.broadcast %cst_75 : f32 to vector<8x32xf32>
    %165 = arith.mulf %164, %161 : vector<8x32xf32>
    %166 = arith.select %163, %161, %165 : vector<8x32xi1>, vector<8x32xf32>
    %167 = arith.truncf %166 : vector<8x32xf32> to vector<8x32xbf16>
    %c0_76 = arith.constant 0 : index
    %c0_77 = arith.constant 0 : index
    %168 = vector.load %arg20[%c0_76, %c0_77] : memref<32x24xbf16, #tpu.memory_space<vmem>>, vector<32x24xbf16>
    %cst_78 = arith.constant dense<0.000000e+00> : vector<8x24xf32>
    %169 = tpu.matmul %167, %168, %cst_78 {dimension_numbers = #tpu.dot_dimension_numbers<[1], [0], [0], [1], [0, 0, 1, 1], [], []>} : vector<8x32xbf16>, vector<32x24xbf16>, vector<8x24xf32> -> vector<8x24xf32>
    %c0_79 = arith.constant 0 : index
    %c0_80 = arith.constant 0 : index
    %170 = vector.load %arg16[%c0_79, %c0_80] : memref<1x24xf32, #tpu.memory_space<vmem>>, vector<1x24xf32>
    %171 = vector.broadcast %170 : vector<1x24xf32> to vector<8x24xf32>
    %172 = arith.addf %169, %171 : vector<8x24xf32>
    %cst_81 = arith.constant dense<0.000000e+00> : vector<8xf32>
    %173 = vector.multi_reduction <add>, %172, %cst_81 [1] : vector<8x24xf32> to vector<8xf32>
    %174 = vector.shape_cast %173 : vector<8xf32> to vector<8x1xf32>
    %cst_82 = arith.constant 2.400000e+01 : f32
    %175 = vector.broadcast %cst_82 : f32 to vector<8x1xf32>
    %176 = arith.divf %174, %175 : vector<8x1xf32>
    %177 = vector.broadcast %176 : vector<8x1xf32> to vector<8x24xf32>
    %178 = arith.subf %172, %177 : vector<8x24xf32>
    %179 = arith.mulf %178, %178 : vector<8x24xf32>
    %cst_83 = arith.constant dense<0.000000e+00> : vector<8xf32>
    %180 = vector.multi_reduction <add>, %179, %cst_83 [1] : vector<8x24xf32> to vector<8xf32>
    %181 = vector.shape_cast %180 : vector<8xf32> to vector<8x1xf32>
    %cst_84 = arith.constant 2.400000e+01 : f32
    %182 = vector.broadcast %cst_84 : f32 to vector<8x1xf32>
    %183 = arith.divf %181, %182 : vector<8x1xf32>
    %184 = vector.broadcast %176 : vector<8x1xf32> to vector<8x24xf32>
    %185 = arith.subf %172, %184 : vector<8x24xf32>
    %cst_85 = arith.constant 9.99999974E-6 : f32
    %186 = vector.broadcast %cst_85 : f32 to vector<8x1xf32>
    %187 = arith.addf %183, %186 : vector<8x1xf32>
    %188 = math.rsqrt %187 : vector<8x1xf32>
    %189 = vector.broadcast %188 : vector<8x1xf32> to vector<8x24xf32>
    %190 = arith.mulf %185, %189 : vector<8x24xf32>
    %191 = vector.broadcast %75 : vector<1x24xf32> to vector<8x24xf32>
    %192 = arith.mulf %190, %191 : vector<8x24xf32>
    %193 = vector.broadcast %76 : vector<1x24xf32> to vector<8x24xf32>
    %194 = arith.addf %192, %193 : vector<8x24xf32>
    %c1 = arith.constant 1 : index
    %195 = memref.load %arg40[%c1] : memref<12xf32, #tpu.memory_space<smem>>
    %196 = vector.broadcast %195 : f32 to vector<8x24xf32>
    %197 = arith.mulf %196, %194 : vector<8x24xf32>
    %198 = arith.addf %133, %197 : vector<8x24xf32>
    %c5 = arith.constant 5 : index
    %199 = memref.load %arg40[%c5] : memref<12xf32, #tpu.memory_space<smem>>
    %200 = vector.broadcast %199 : f32 to vector<8x24xf32>
    %201 = arith.mulf %200, %194 : vector<8x24xf32>
    %202 = arith.addf %137, %201 : vector<8x24xf32>
    %c9 = arith.constant 9 : index
    %203 = memref.load %arg40[%c9] : memref<12xf32, #tpu.memory_space<smem>>
    %204 = vector.broadcast %203 : f32 to vector<8x24xf32>
    %205 = arith.mulf %204, %194 : vector<8x24xf32>
    %206 = arith.addf %141, %205 : vector<8x24xf32>
    %207 = vector.extract_strided_slice %22 {offsets = [0, 16], sizes = [8, 16], strides = [1, 1]} : vector<8x130xf32> to vector<8x16xf32>
    %c0_86 = arith.constant 0 : index
    %208 = memref.load %arg50[%c0_86] : memref<1xf32, #tpu.memory_space<smem>>
    %209 = vector.broadcast %208 : f32 to vector<8x16xf32>
    %210 = arith.addf %207, %209 : vector<8x16xf32>
    %211 = math.tanh %210 : vector<8x16xf32>
    %212 = arith.truncf %211 : vector<8x16xf32> to vector<8x16xbf16>
    %c0_87 = arith.constant 0 : index
    %c0_88 = arith.constant 0 : index
    %213 = vector.load %arg53[%c0_87, %c0_88] : memref<16x32xbf16, #tpu.memory_space<vmem>>, vector<16x32xbf16>
    %cst_89 = arith.constant dense<0.000000e+00> : vector<8x32xf32>
    %214 = tpu.matmul %212, %213, %cst_89 {dimension_numbers = #tpu.dot_dimension_numbers<[1], [0], [0], [1], [0, 0, 1, 1], [], []>} : vector<8x16xbf16>, vector<16x32xbf16>, vector<8x32xf32> -> vector<8x32xf32>
    %c0_90 = arith.constant 0 : index
    %c0_91 = arith.constant 0 : index
    %215 = vector.load %arg48[%c0_90, %c0_91] : memref<1x32xf32, #tpu.memory_space<vmem>>, vector<1x32xf32>
    %216 = vector.broadcast %215 : vector<1x32xf32> to vector<8x32xf32>
    %217 = arith.addf %214, %216 : vector<8x32xf32>
    %cst_92 = arith.constant 0.000000e+00 : f32
    %218 = vector.broadcast %cst_92 : f32 to vector<8x32xf32>
    %219 = arith.cmpf ogt, %217, %218 : vector<8x32xf32>
    %cst_93 = arith.constant 0.00999999977 : f32
    %220 = vector.broadcast %cst_93 : f32 to vector<8x32xf32>
    %221 = arith.mulf %220, %217 : vector<8x32xf32>
    %222 = arith.select %219, %217, %221 : vector<8x32xi1>, vector<8x32xf32>
    %223 = arith.truncf %222 : vector<8x32xf32> to vector<8x32xbf16>
    %c0_94 = arith.constant 0 : index
    %c0_95 = arith.constant 0 : index
    %224 = vector.load %arg54[%c0_94, %c0_95] : memref<32x8xbf16, #tpu.memory_space<vmem>>, vector<32x8xbf16>
    %cst_96 = arith.constant dense<0.000000e+00> : vector<8x8xf32>
    %225 = tpu.matmul %223, %224, %cst_96 {dimension_numbers = #tpu.dot_dimension_numbers<[1], [0], [0], [1], [0, 0, 1, 1], [], []>} : vector<8x32xbf16>, vector<32x8xbf16>, vector<8x8xf32> -> vector<8x8xf32>
    %c0_97 = arith.constant 0 : index
    %c0_98 = arith.constant 0 : index
    %226 = vector.load %arg49[%c0_97, %c0_98] : memref<1x8xf32, #tpu.memory_space<vmem>>, vector<1x8xf32>
    %227 = vector.broadcast %226 : vector<1x8xf32> to vector<8x8xf32>
    %228 = arith.addf %225, %227 : vector<8x8xf32>
    %c0_99 = arith.constant 0 : index
    %c0_100 = arith.constant 0 : index
    %229 = vector.load %arg52[%c0_99, %c0_100] : memref<1x8xf32, #tpu.memory_space<vmem>>, vector<1x8xf32>
    %c0_101 = arith.constant 0 : index
    %c0_102 = arith.constant 0 : index
    %230 = vector.load %arg51[%c0_101, %c0_102] : memref<1x8xf32, #tpu.memory_space<vmem>>, vector<1x8xf32>
    %cst_103 = arith.constant dense<0.000000e+00> : vector<8xf32>
    %231 = vector.multi_reduction <add>, %228, %cst_103 [1] : vector<8x8xf32> to vector<8xf32>
    %232 = vector.shape_cast %231 : vector<8xf32> to vector<8x1xf32>
    %cst_104 = arith.constant 8.000000e+00 : f32
    %233 = vector.broadcast %cst_104 : f32 to vector<8x1xf32>
    %234 = arith.divf %232, %233 : vector<8x1xf32>
    %235 = vector.broadcast %234 : vector<8x1xf32> to vector<8x8xf32>
    %236 = arith.subf %228, %235 : vector<8x8xf32>
    %237 = arith.mulf %236, %236 : vector<8x8xf32>
    %cst_105 = arith.constant dense<0.000000e+00> : vector<8xf32>
    %238 = vector.multi_reduction <add>, %237, %cst_105 [1] : vector<8x8xf32> to vector<8xf32>
    %239 = vector.shape_cast %238 : vector<8xf32> to vector<8x1xf32>
    %cst_106 = arith.constant 8.000000e+00 : f32
    %240 = vector.broadcast %cst_106 : f32 to vector<8x1xf32>
    %241 = arith.divf %239, %240 : vector<8x1xf32>
    %242 = vector.broadcast %234 : vector<8x1xf32> to vector<8x8xf32>
    %243 = arith.subf %228, %242 : vector<8x8xf32>
    %cst_107 = arith.constant 9.99999974E-6 : f32
    %244 = vector.broadcast %cst_107 : f32 to vector<8x1xf32>
    %245 = arith.addf %241, %244 : vector<8x1xf32>
    %246 = math.rsqrt %245 : vector<8x1xf32>
    %247 = vector.broadcast %246 : vector<8x1xf32> to vector<8x8xf32>
    %248 = arith.mulf %243, %247 : vector<8x8xf32>
    %249 = vector.broadcast %229 : vector<1x8xf32> to vector<8x8xf32>
    %250 = arith.mulf %248, %249 : vector<8x8xf32>
    %251 = vector.broadcast %230 : vector<1x8xf32> to vector<8x8xf32>
    %252 = arith.addf %250, %251 : vector<8x8xf32>
    %253 = arith.truncf %252 : vector<8x8xf32> to vector<8x8xbf16>
    %c0_108 = arith.constant 0 : index
    %c0_109 = arith.constant 0 : index
    %254 = vector.load %arg4[%c0_108, %c0_109] : memref<8x49xbf16, #tpu.memory_space<vmem>>, vector<8x49xbf16>
    %cst_110 = arith.constant dense<0.000000e+00> : vector<8x49xf32>
    %255 = tpu.matmul %253, %254, %cst_110 {dimension_numbers = #tpu.dot_dimension_numbers<[1], [0], [0], [1], [0, 0, 1, 1], [], []>} : vector<8x8xbf16>, vector<8x49xbf16>, vector<8x49xf32> -> vector<8x49xf32>
    %c0_111 = arith.constant 0 : index
    %c0_112 = arith.constant 0 : index
    %256 = vector.load %arg22[%c0_111, %c0_112] : memref<1x24xf32, #tpu.memory_space<vmem>>, vector<1x24xf32>
    %c0_113 = arith.constant 0 : index
    %c0_114 = arith.constant 0 : index
    %257 = vector.load %arg21[%c0_113, %c0_114] : memref<1x24xf32, #tpu.memory_space<vmem>>, vector<1x24xf32>
    %258 = vector.extract_strided_slice %22 {offsets = [0, 81], sizes = [8, 24], strides = [1, 1]} : vector<8x130xf32> to vector<8x24xf32>
    %259 = vector.extract_strided_slice %255 {offsets = [0, 0], sizes = [8, 24], strides = [1, 1]} : vector<8x49xf32> to vector<8x24xf32>
    %260 = arith.addf %258, %259 : vector<8x24xf32>
    %c0_115 = arith.constant 0 : index
    %261 = memref.load %arg24[%c0_115] : memref<1xf32, #tpu.memory_space<smem>>
    %262 = vector.broadcast %261 : f32 to vector<8x24xf32>
    %263 = arith.addf %260, %262 : vector<8x24xf32>
    %264 = math.tanh %263 : vector<8x24xf32>
    %265 = arith.truncf %264 : vector<8x24xf32> to vector<8x24xbf16>
    %c0_116 = arith.constant 0 : index
    %c0_117 = arith.constant 0 : index
    %266 = vector.load %arg27[%c0_116, %c0_117] : memref<24x4xbf16, #tpu.memory_space<vmem>>, vector<24x4xbf16>
    %cst_118 = arith.constant dense<0.000000e+00> : vector<8x4xf32>
    %267 = tpu.matmul %265, %266, %cst_118 {dimension_numbers = #tpu.dot_dimension_numbers<[1], [0], [0], [1], [0, 0, 1, 1], [], []>} : vector<8x24xbf16>, vector<24x4xbf16>, vector<8x4xf32> -> vector<8x4xf32>
    %c0_119 = arith.constant 0 : index
    %268 = memref.load %arg26[%c0_119] : memref<1xf32, #tpu.memory_space<smem>>
    %269 = vector.broadcast %268 : f32 to vector<8x4xf32>
    %270 = arith.addf %267, %269 : vector<8x4xf32>
    %271 = math.tanh %270 : vector<8x4xf32>
    %272 = arith.truncf %271 : vector<8x4xf32> to vector<8x4xbf16>
    %c0_120 = arith.constant 0 : index
    %c0_121 = arith.constant 0 : index
    %273 = vector.load %arg28[%c0_120, %c0_121] : memref<4x32xbf16, #tpu.memory_space<vmem>>, vector<4x32xbf16>
    %cst_122 = arith.constant dense<0.000000e+00> : vector<8x32xf32>
    %274 = tpu.matmul %272, %273, %cst_122 {dimension_numbers = #tpu.dot_dimension_numbers<[1], [0], [0], [1], [0, 0, 1, 1], [], []>} : vector<8x4xbf16>, vector<4x32xbf16>, vector<8x32xf32> -> vector<8x32xf32>
    %c0_123 = arith.constant 0 : index
    %c0_124 = arith.constant 0 : index
    %275 = vector.load %arg23[%c0_123, %c0_124] : memref<1x32xf32, #tpu.memory_space<vmem>>, vector<1x32xf32>
    %276 = vector.broadcast %275 : vector<1x32xf32> to vector<8x32xf32>
    %277 = arith.addf %274, %276 : vector<8x32xf32>
    %cst_125 = arith.constant 0.000000e+00 : f32
    %278 = vector.broadcast %cst_125 : f32 to vector<8x32xf32>
    %279 = arith.cmpf ogt, %277, %278 : vector<8x32xf32>
    %cst_126 = arith.constant 0.00999999977 : f32
    %280 = vector.broadcast %cst_126 : f32 to vector<8x32xf32>
    %281 = arith.mulf %280, %277 : vector<8x32xf32>
    %282 = arith.select %279, %277, %281 : vector<8x32xi1>, vector<8x32xf32>
    %283 = arith.truncf %282 : vector<8x32xf32> to vector<8x32xbf16>
    %c0_127 = arith.constant 0 : index
    %c0_128 = arith.constant 0 : index
    %284 = vector.load %arg29[%c0_127, %c0_128] : memref<32x24xbf16, #tpu.memory_space<vmem>>, vector<32x24xbf16>
    %cst_129 = arith.constant dense<0.000000e+00> : vector<8x24xf32>
    %285 = tpu.matmul %283, %284, %cst_129 {dimension_numbers = #tpu.dot_dimension_numbers<[1], [0], [0], [1], [0, 0, 1, 1], [], []>} : vector<8x32xbf16>, vector<32x24xbf16>, vector<8x24xf32> -> vector<8x24xf32>
    %c0_130 = arith.constant 0 : index
    %c0_131 = arith.constant 0 : index
    %286 = vector.load %arg25[%c0_130, %c0_131] : memref<1x24xf32, #tpu.memory_space<vmem>>, vector<1x24xf32>
    %287 = vector.broadcast %286 : vector<1x24xf32> to vector<8x24xf32>
    %288 = arith.addf %285, %287 : vector<8x24xf32>
    %cst_132 = arith.constant dense<0.000000e+00> : vector<8xf32>
    %289 = vector.multi_reduction <add>, %288, %cst_132 [1] : vector<8x24xf32> to vector<8xf32>
    %290 = vector.shape_cast %289 : vector<8xf32> to vector<8x1xf32>
    %cst_133 = arith.constant 2.400000e+01 : f32
    %291 = vector.broadcast %cst_133 : f32 to vector<8x1xf32>
    %292 = arith.divf %290, %291 : vector<8x1xf32>
    %293 = vector.broadcast %292 : vector<8x1xf32> to vector<8x24xf32>
    %294 = arith.subf %288, %293 : vector<8x24xf32>
    %295 = arith.mulf %294, %294 : vector<8x24xf32>
    %cst_134 = arith.constant dense<0.000000e+00> : vector<8xf32>
    %296 = vector.multi_reduction <add>, %295, %cst_134 [1] : vector<8x24xf32> to vector<8xf32>
    %297 = vector.shape_cast %296 : vector<8xf32> to vector<8x1xf32>
    %cst_135 = arith.constant 2.400000e+01 : f32
    %298 = vector.broadcast %cst_135 : f32 to vector<8x1xf32>
    %299 = arith.divf %297, %298 : vector<8x1xf32>
    %300 = vector.broadcast %292 : vector<8x1xf32> to vector<8x24xf32>
    %301 = arith.subf %288, %300 : vector<8x24xf32>
    %cst_136 = arith.constant 9.99999974E-6 : f32
    %302 = vector.broadcast %cst_136 : f32 to vector<8x1xf32>
    %303 = arith.addf %299, %302 : vector<8x1xf32>
    %304 = math.rsqrt %303 : vector<8x1xf32>
    %305 = vector.broadcast %304 : vector<8x1xf32> to vector<8x24xf32>
    %306 = arith.mulf %301, %305 : vector<8x24xf32>
    %307 = vector.broadcast %256 : vector<1x24xf32> to vector<8x24xf32>
    %308 = arith.mulf %306, %307 : vector<8x24xf32>
    %309 = vector.broadcast %257 : vector<1x24xf32> to vector<8x24xf32>
    %310 = arith.addf %308, %309 : vector<8x24xf32>
    %c2 = arith.constant 2 : index
    %311 = memref.load %arg40[%c2] : memref<12xf32, #tpu.memory_space<smem>>
    %312 = vector.broadcast %311 : f32 to vector<8x24xf32>
    %313 = arith.mulf %312, %310 : vector<8x24xf32>
    %314 = arith.addf %198, %313 : vector<8x24xf32>
    %c6 = arith.constant 6 : index
    %315 = memref.load %arg40[%c6] : memref<12xf32, #tpu.memory_space<smem>>
    %316 = vector.broadcast %315 : f32 to vector<8x24xf32>
    %317 = arith.mulf %316, %310 : vector<8x24xf32>
    %318 = arith.addf %202, %317 : vector<8x24xf32>
    %c10 = arith.constant 10 : index
    %319 = memref.load %arg40[%c10] : memref<12xf32, #tpu.memory_space<smem>>
    %320 = vector.broadcast %319 : f32 to vector<8x24xf32>
    %321 = arith.mulf %320, %310 : vector<8x24xf32>
    %322 = arith.addf %206, %321 : vector<8x24xf32>
    %323 = vector.extract_strided_slice %22 {offsets = [0, 105], sizes = [8, 25], strides = [1, 1]} : vector<8x130xf32> to vector<8x25xf32>
    %324 = vector.extract_strided_slice %255 {offsets = [0, 24], sizes = [8, 25], strides = [1, 1]} : vector<8x49xf32> to vector<8x25xf32>
    %325 = arith.addf %323, %324 : vector<8x25xf32>
    %c0_137 = arith.constant 0 : index
    %326 = memref.load %arg31[%c0_137] : memref<1xf32, #tpu.memory_space<smem>>
    %327 = vector.broadcast %326 : f32 to vector<8x25xf32>
    %328 = arith.addf %325, %327 : vector<8x25xf32>
    %329 = math.tanh %328 : vector<8x25xf32>
    %330 = arith.truncf %329 : vector<8x25xf32> to vector<8x25xbf16>
    %c0_138 = arith.constant 0 : index
    %c0_139 = arith.constant 0 : index
    %331 = vector.load %arg34[%c0_138, %c0_139] : memref<25x5xbf16, #tpu.memory_space<vmem>>, vector<25x5xbf16>
    %cst_140 = arith.constant dense<0.000000e+00> : vector<8x5xf32>
    %332 = tpu.matmul %330, %331, %cst_140 {dimension_numbers = #tpu.dot_dimension_numbers<[1], [0], [0], [1], [0, 0, 1, 1], [], []>} : vector<8x25xbf16>, vector<25x5xbf16>, vector<8x5xf32> -> vector<8x5xf32>
    %c0_141 = arith.constant 0 : index
    %333 = memref.load %arg33[%c0_141] : memref<1xf32, #tpu.memory_space<smem>>
    %334 = vector.broadcast %333 : f32 to vector<8x5xf32>
    %335 = arith.addf %332, %334 : vector<8x5xf32>
    %336 = math.tanh %335 : vector<8x5xf32>
    %337 = arith.truncf %336 : vector<8x5xf32> to vector<8x5xbf16>
    %c0_142 = arith.constant 0 : index
    %c0_143 = arith.constant 0 : index
    %338 = vector.load %arg35[%c0_142, %c0_143] : memref<5x32xbf16, #tpu.memory_space<vmem>>, vector<5x32xbf16>
    %cst_144 = arith.constant dense<0.000000e+00> : vector<8x32xf32>
    %339 = tpu.matmul %337, %338, %cst_144 {dimension_numbers = #tpu.dot_dimension_numbers<[1], [0], [0], [1], [0, 0, 1, 1], [], []>} : vector<8x5xbf16>, vector<5x32xbf16>, vector<8x32xf32> -> vector<8x32xf32>
    %c0_145 = arith.constant 0 : index
    %c0_146 = arith.constant 0 : index
    %340 = vector.load %arg30[%c0_145, %c0_146] : memref<1x32xf32, #tpu.memory_space<vmem>>, vector<1x32xf32>
    %341 = vector.broadcast %340 : vector<1x32xf32> to vector<8x32xf32>
    %342 = arith.addf %339, %341 : vector<8x32xf32>
    %cst_147 = arith.constant 0.000000e+00 : f32
    %343 = vector.broadcast %cst_147 : f32 to vector<8x32xf32>
    %344 = arith.cmpf ogt, %342, %343 : vector<8x32xf32>
    %cst_148 = arith.constant 0.00999999977 : f32
    %345 = vector.broadcast %cst_148 : f32 to vector<8x32xf32>
    %346 = arith.mulf %345, %342 : vector<8x32xf32>
    %347 = arith.select %344, %342, %346 : vector<8x32xi1>, vector<8x32xf32>
    %348 = arith.truncf %347 : vector<8x32xf32> to vector<8x32xbf16>
    %c0_149 = arith.constant 0 : index
    %c0_150 = arith.constant 0 : index
    %349 = vector.load %arg36[%c0_149, %c0_150] : memref<32x24xbf16, #tpu.memory_space<vmem>>, vector<32x24xbf16>
    %cst_151 = arith.constant dense<0.000000e+00> : vector<8x24xf32>
    %350 = tpu.matmul %348, %349, %cst_151 {dimension_numbers = #tpu.dot_dimension_numbers<[1], [0], [0], [1], [0, 0, 1, 1], [], []>} : vector<8x32xbf16>, vector<32x24xbf16>, vector<8x24xf32> -> vector<8x24xf32>
    %c0_152 = arith.constant 0 : index
    %c0_153 = arith.constant 0 : index
    %351 = vector.load %arg32[%c0_152, %c0_153] : memref<1x24xf32, #tpu.memory_space<vmem>>, vector<1x24xf32>
    %352 = vector.broadcast %351 : vector<1x24xf32> to vector<8x24xf32>
    %353 = arith.addf %350, %352 : vector<8x24xf32>
    %cst_154 = arith.constant dense<0.000000e+00> : vector<8xf32>
    %354 = vector.multi_reduction <add>, %353, %cst_154 [1] : vector<8x24xf32> to vector<8xf32>
    %355 = vector.shape_cast %354 : vector<8xf32> to vector<8x1xf32>
    %cst_155 = arith.constant 2.400000e+01 : f32
    %356 = vector.broadcast %cst_155 : f32 to vector<8x1xf32>
    %357 = arith.divf %355, %356 : vector<8x1xf32>
    %358 = vector.broadcast %357 : vector<8x1xf32> to vector<8x24xf32>
    %359 = arith.subf %353, %358 : vector<8x24xf32>
    %360 = arith.mulf %359, %359 : vector<8x24xf32>
    %cst_156 = arith.constant dense<0.000000e+00> : vector<8xf32>
    %361 = vector.multi_reduction <add>, %360, %cst_156 [1] : vector<8x24xf32> to vector<8xf32>
    %362 = vector.shape_cast %361 : vector<8xf32> to vector<8x1xf32>
    %cst_157 = arith.constant 2.400000e+01 : f32
    %363 = vector.broadcast %cst_157 : f32 to vector<8x1xf32>
    %364 = arith.divf %362, %363 : vector<8x1xf32>
    %365 = vector.broadcast %357 : vector<8x1xf32> to vector<8x24xf32>
    %366 = arith.subf %353, %365 : vector<8x24xf32>
    %cst_158 = arith.constant 9.99999974E-6 : f32
    %367 = vector.broadcast %cst_158 : f32 to vector<8x1xf32>
    %368 = arith.addf %364, %367 : vector<8x1xf32>
    %369 = math.rsqrt %368 : vector<8x1xf32>
    %370 = vector.broadcast %369 : vector<8x1xf32> to vector<8x24xf32>
    %371 = arith.mulf %366, %370 : vector<8x24xf32>
    %372 = vector.broadcast %256 : vector<1x24xf32> to vector<8x24xf32>
    %373 = arith.mulf %371, %372 : vector<8x24xf32>
    %374 = vector.broadcast %257 : vector<1x24xf32> to vector<8x24xf32>
    %375 = arith.addf %373, %374 : vector<8x24xf32>
    %c3 = arith.constant 3 : index
    %376 = memref.load %arg40[%c3] : memref<12xf32, #tpu.memory_space<smem>>
    %377 = vector.broadcast %376 : f32 to vector<8x24xf32>
    %378 = arith.mulf %377, %375 : vector<8x24xf32>
    %379 = arith.addf %314, %378 : vector<8x24xf32>
    %c7 = arith.constant 7 : index
    %380 = memref.load %arg40[%c7] : memref<12xf32, #tpu.memory_space<smem>>
    %381 = vector.broadcast %380 : f32 to vector<8x24xf32>
    %382 = arith.mulf %381, %375 : vector<8x24xf32>
    %383 = arith.addf %318, %382 : vector<8x24xf32>
    %c11 = arith.constant 11 : index
    %384 = memref.load %arg40[%c11] : memref<12xf32, #tpu.memory_space<smem>>
    %385 = vector.broadcast %384 : f32 to vector<8x24xf32>
    %386 = arith.mulf %385, %375 : vector<8x24xf32>
    %387 = arith.addf %322, %386 : vector<8x24xf32>
    %cst_159 = arith.constant 0.000000e+00 : f32
    %388 = vector.broadcast %cst_159 : f32 to vector<8x1xf32>
    %389 = vector.extract_strided_slice %379 {offsets = [0, 0], sizes = [8, 23], strides = [1, 1]} : vector<8x24xf32> to vector<8x23xf32>
    %390 = tpu.concatenate %388, %389 in 1 : vector<8x1xf32>, vector<8x23xf32> -> vector<8x24xf32>
    %391 = vector.extract_strided_slice %387 {offsets = [0, 1], sizes = [8, 23], strides = [1, 1]} : vector<8x24xf32> to vector<8x23xf32>
    %392 = tpu.concatenate %391, %388 in 1 : vector<8x23xf32>, vector<8x1xf32> -> vector<8x24xf32>
    %393 = arith.addf %383, %390 : vector<8x24xf32>
    %394 = arith.addf %393, %392 : vector<8x24xf32>
    %c0_160 = arith.constant 0 : index
    %395 = memref.load %arg39[%c0_160] : memref<1xf32, #tpu.memory_space<smem>>
    %396 = vector.broadcast %395 : f32 to vector<8x24xf32>
    %397 = arith.addf %394, %396 : vector<8x24xf32>
    %c0_161 = arith.constant 0 : index
    %c0_162 = arith.constant 0 : index
    %398 = vector.load %arg38[%c0_161, %c0_162] : memref<1x24xf32, #tpu.memory_space<vmem>>, vector<1x24xf32>
    %c0_163 = arith.constant 0 : index
    %c0_164 = arith.constant 0 : index
    %399 = vector.load %arg37[%c0_163, %c0_164] : memref<1x24xf32, #tpu.memory_space<vmem>>, vector<1x24xf32>
    %cst_165 = arith.constant dense<0.000000e+00> : vector<8xf32>
    %400 = vector.multi_reduction <add>, %397, %cst_165 [1] : vector<8x24xf32> to vector<8xf32>
    %401 = vector.shape_cast %400 : vector<8xf32> to vector<8x1xf32>
    %cst_166 = arith.constant 2.400000e+01 : f32
    %402 = vector.broadcast %cst_166 : f32 to vector<8x1xf32>
    %403 = arith.divf %401, %402 : vector<8x1xf32>
    %404 = vector.broadcast %403 : vector<8x1xf32> to vector<8x24xf32>
    %405 = arith.subf %397, %404 : vector<8x24xf32>
    %406 = arith.mulf %405, %405 : vector<8x24xf32>
    %cst_167 = arith.constant dense<0.000000e+00> : vector<8xf32>
    %407 = vector.multi_reduction <add>, %406, %cst_167 [1] : vector<8x24xf32> to vector<8xf32>
    %408 = vector.shape_cast %407 : vector<8xf32> to vector<8x1xf32>
    %cst_168 = arith.constant 2.400000e+01 : f32
    %409 = vector.broadcast %cst_168 : f32 to vector<8x1xf32>
    %410 = arith.divf %408, %409 : vector<8x1xf32>
    %411 = vector.broadcast %403 : vector<8x1xf32> to vector<8x24xf32>
    %412 = arith.subf %397, %411 : vector<8x24xf32>
    %cst_169 = arith.constant 9.99999974E-6 : f32
    %413 = vector.broadcast %cst_169 : f32 to vector<8x1xf32>
    %414 = arith.addf %410, %413 : vector<8x1xf32>
    %415 = math.rsqrt %414 : vector<8x1xf32>
    %416 = vector.broadcast %415 : vector<8x1xf32> to vector<8x24xf32>
    %417 = arith.mulf %412, %416 : vector<8x24xf32>
    %418 = vector.broadcast %398 : vector<1x24xf32> to vector<8x24xf32>
    %419 = arith.mulf %417, %418 : vector<8x24xf32>
    %420 = vector.broadcast %399 : vector<1x24xf32> to vector<8x24xf32>
    %421 = arith.addf %419, %420 : vector<8x24xf32>
    %422 = vector.extract_strided_slice %421 {offsets = [0, 16], sizes = [8, 8], strides = [1, 1]} : vector<8x24xf32> to vector<8x8xf32>
    %423 = vector.broadcast %19 : vector<8x1xf32> to vector<8x8xf32>
    %424 = arith.mulf %422, %423 : vector<8x8xf32>
    %425 = vector.broadcast %4 : vector<8x1xf32> to vector<8x8xf32>
    %426 = arith.addf %424, %425 : vector<8x8xf32>
    %cst_170 = arith.constant 0.000000e+00 : f32
    %427 = vector.broadcast %cst_170 : f32 to vector<8x120xf32>
    %428 = tpu.concatenate %426, %427 in 1 : vector<8x8xf32>, vector<8x120xf32> -> vector<8x128xf32>
    %c0_171 = arith.constant 0 : index
    %c0_172 = arith.constant 0 : index
    %429 = vector.load %arg55[%c0_171, %c0_172] : memref<8x128xf32, #tpu.memory_space<vmem>>, vector<8x128xf32>
    tpu.vector_store %arg55[%c0_171, %c0_172], %428 {strides = array<i32>} : memref<8x128xf32, #tpu.memory_space<vmem>>, vector<8x128xf32>,
    return
  }
  func.func @transform_0(%arg0: i32) -> (i32, i32) {
    %c0_i32 = arith.constant 0 : i32
    %c0_i32_0 = arith.constant 0 : i32
    return %arg0, %c0_i32 : i32, i32
  }
  func.func @transform_1(%arg0: i32) -> (i32, i32) {
    %c0_i32 = arith.constant 0 : i32
    %c0_i32_0 = arith.constant 0 : i32
    %c0_i32_1 = arith.constant 0 : i32
    return %c0_i32, %c0_i32_0 : i32, i32
  }
  func.func @transform_2(%arg0: i32) -> (i32, i32) {
    %c0_i32 = arith.constant 0 : i32
    %c0_i32_0 = arith.constant 0 : i32
    %c0_i32_1 = arith.constant 0 : i32
    return %c0_i32, %c0_i32_0 : i32, i32
  }
  func.func @transform_3(%arg0: i32) -> (i32, i32) {
    %c0_i32 = arith.constant 0 : i32
    %c0_i32_0 = arith.constant 0 : i32
    %c0_i32_1 = arith.constant 0 : i32
    return %c0_i32, %c0_i32_0 : i32, i32
  }
  func.func @transform_4(%arg0: i32) -> (i32, i32) {
    %c0_i32 = arith.constant 0 : i32
    %c0_i32_0 = arith.constant 0 : i32
    %c0_i32_1 = arith.constant 0 : i32
    return %c0_i32, %c0_i32_0 : i32, i32
  }
  func.func @transform_5(%arg0: i32) -> (i32, i32) {
    %c0_i32 = arith.constant 0 : i32
    %c0_i32_0 = arith.constant 0 : i32
    %c0_i32_1 = arith.constant 0 : i32
    return %c0_i32, %c0_i32_0 : i32, i32
  }
  func.func @transform_6(%arg0: i32) -> (i32, i32) {
    %c0_i32 = arith.constant 0 : i32
    %c0_i32_0 = arith.constant 0 : i32
    %c0_i32_1 = arith.constant 0 : i32
    return %c0_i32, %c0_i32_0 : i32, i32
  }
  func.func @transform_7(%arg0: i32) -> i32 {
    %c0_i32 = arith.constant 0 : i32
    %c0_i32_0 = arith.constant 0 : i32
    return %c0_i32 : i32
  }
  func.func @transform_8(%arg0: i32) -> (i32, i32) {
    %c0_i32 = arith.constant 0 : i32
    %c0_i32_0 = arith.constant 0 : i32
    %c0_i32_1 = arith.constant 0 : i32
    return %c0_i32, %c0_i32_0 : i32, i32
  }
  func.func @transform_9(%arg0: i32) -> i32 {
    %c0_i32 = arith.constant 0 : i32
    %c0_i32_0 = arith.constant 0 : i32
    return %c0_i32 : i32
  }
  func.func @transform_10(%arg0: i32) -> (i32, i32) {
    %c0_i32 = arith.constant 0 : i32
    %c0_i32_0 = arith.constant 0 : i32
    %c0_i32_1 = arith.constant 0 : i32
    return %c0_i32, %c0_i32_0 : i32, i32
  }
  func.func @transform_11(%arg0: i32) -> (i32, i32) {
    %c0_i32 = arith.constant 0 : i32
    %c0_i32_0 = arith.constant 0 : i32
    %c0_i32_1 = arith.constant 0 : i32
    return %c0_i32, %c0_i32_0 : i32, i32
  }
  func.func @transform_12(%arg0: i32) -> (i32, i32) {
    %c0_i32 = arith.constant 0 : i32
    %c0_i32_0 = arith.constant 0 : i32
    %c0_i32_1 = arith.constant 0 : i32
    return %c0_i32, %c0_i32_0 : i32, i32
  }
  func.func @transform_13(%arg0: i32) -> (i32, i32) {
    %c0_i32 = arith.constant 0 : i32
    %c0_i32_0 = arith.constant 0 : i32
    %c0_i32_1 = arith.constant 0 : i32
    return %c0_i32, %c0_i32_0 : i32, i32
  }
  func.func @transform_14(%arg0: i32) -> i32 {
    %c0_i32 = arith.constant 0 : i32
    %c0_i32_0 = arith.constant 0 : i32
    return %c0_i32 : i32
  }
  func.func @transform_15(%arg0: i32) -> (i32, i32) {
    %c0_i32 = arith.constant 0 : i32
    %c0_i32_0 = arith.constant 0 : i32
    %c0_i32_1 = arith.constant 0 : i32
    return %c0_i32, %c0_i32_0 : i32, i32
  }
  func.func @transform_16(%arg0: i32) -> i32 {
    %c0_i32 = arith.constant 0 : i32
    %c0_i32_0 = arith.constant 0 : i32
    return %c0_i32 : i32
  }
  func.func @transform_17(%arg0: i32) -> (i32, i32) {
    %c0_i32 = arith.constant 0 : i32
    %c0_i32_0 = arith.constant 0 : i32
    %c0_i32_1 = arith.constant 0 : i32
    return %c0_i32, %c0_i32_0 : i32, i32
  }
  func.func @transform_18(%arg0: i32) -> (i32, i32) {
    %c0_i32 = arith.constant 0 : i32
    %c0_i32_0 = arith.constant 0 : i32
    %c0_i32_1 = arith.constant 0 : i32
    return %c0_i32, %c0_i32_0 : i32, i32
  }
  func.func @transform_19(%arg0: i32) -> (i32, i32) {
    %c0_i32 = arith.constant 0 : i32
    %c0_i32_0 = arith.constant 0 : i32
    %c0_i32_1 = arith.constant 0 : i32
    return %c0_i32, %c0_i32_0 : i32, i32
  }
  func.func @transform_20(%arg0: i32) -> (i32, i32) {
    %c0_i32 = arith.constant 0 : i32
    %c0_i32_0 = arith.constant 0 : i32
    %c0_i32_1 = arith.constant 0 : i32
    return %c0_i32, %c0_i32_0 : i32, i32
  }
  func.func @transform_21(%arg0: i32) -> (i32, i32) {
    %c0_i32 = arith.constant 0 : i32
    %c0_i32_0 = arith.constant 0 : i32
    %c0_i32_1 = arith.constant 0 : i32
    return %c0_i32, %c0_i32_0 : i32, i32
  }
  func.func @transform_22(%arg0: i32) -> (i32, i32) {
    %c0_i32 = arith.constant 0 : i32
    %c0_i32_0 = arith.constant 0 : i32
    %c0_i32_1 = arith.constant 0 : i32
    return %c0_i32, %c0_i32_0 : i32, i32
  }
  func.func @transform_23(%arg0: i32) -> i32 {
    %c0_i32 = arith.constant 0 : i32
    %c0_i32_0 = arith.constant 0 : i32
    return %c0_i32 : i32
  }
  func.func @transform_24(%arg0: i32) -> (i32, i32) {
    %c0_i32 = arith.constant 0 : i32
    %c0_i32_0 = arith.constant 0 : i32
    %c0_i32_1 = arith.constant 0 : i32
    return %c0_i32, %c0_i32_0 : i32, i32
  }
  func.func @transform_25(%arg0: i32) -> i32 {
    %c0_i32 = arith.constant 0 : i32
    %c0_i32_0 = arith.constant 0 : i32
    return %c0_i32 : i32
  }
  func.func @transform_26(%arg0: i32) -> (i32, i32) {
    %c0_i32 = arith.constant 0 : i32
    %c0_i32_0 = arith.constant 0 : i32
    %c0_i32_1 = arith.constant 0 : i32
    return %c0_i32, %c0_i32_0 : i32, i32
  }
  func.func @transform_27(%arg0: i32) -> (i32, i32) {
    %c0_i32 = arith.constant 0 : i32
    %c0_i32_0 = arith.constant 0 : i32
    %c0_i32_1 = arith.constant 0 : i32
    return %c0_i32, %c0_i32_0 : i32, i32
  }
  func.func @transform_28(%arg0: i32) -> (i32, i32) {
    %c0_i32 = arith.constant 0 : i32
    %c0_i32_0 = arith.constant 0 : i32
    %c0_i32_1 = arith.constant 0 : i32
    return %c0_i32, %c0_i32_0 : i32, i32
  }
  func.func @transform_29(%arg0: i32) -> (i32, i32) {
    %c0_i32 = arith.constant 0 : i32
    %c0_i32_0 = arith.constant 0 : i32
    %c0_i32_1 = arith.constant 0 : i32
    return %c0_i32, %c0_i32_0 : i32, i32
  }
  func.func @transform_30(%arg0: i32) -> i32 {
    %c0_i32 = arith.constant 0 : i32
    %c0_i32_0 = arith.constant 0 : i32
    return %c0_i32 : i32
  }
  func.func @transform_31(%arg0: i32) -> (i32, i32) {
    %c0_i32 = arith.constant 0 : i32
    %c0_i32_0 = arith.constant 0 : i32
    %c0_i32_1 = arith.constant 0 : i32
    return %c0_i32, %c0_i32_0 : i32, i32
  }
  func.func @transform_32(%arg0: i32) -> i32 {
    %c0_i32 = arith.constant 0 : i32
    %c0_i32_0 = arith.constant 0 : i32
    return %c0_i32 : i32
  }
  func.func @transform_33(%arg0: i32) -> (i32, i32) {
    %c0_i32 = arith.constant 0 : i32
    %c0_i32_0 = arith.constant 0 : i32
    %c0_i32_1 = arith.constant 0 : i32
    return %c0_i32, %c0_i32_0 : i32, i32
  }
  func.func @transform_34(%arg0: i32) -> (i32, i32) {
    %c0_i32 = arith.constant 0 : i32
    %c0_i32_0 = arith.constant 0 : i32
    %c0_i32_1 = arith.constant 0 : i32
    return %c0_i32, %c0_i32_0 : i32, i32
  }
  func.func @transform_35(%arg0: i32) -> (i32, i32) {
    %c0_i32 = arith.constant 0 : i32
    %c0_i32_0 = arith.constant 0 : i32
    %c0_i32_1 = arith.constant 0 : i32
    return %c0_i32, %c0_i32_0 : i32, i32
  }
  func.func @transform_36(%arg0: i32) -> (i32, i32) {
    %c0_i32 = arith.constant 0 : i32
    %c0_i32_0 = arith.constant 0 : i32
    %c0_i32_1 = arith.constant 0 : i32
    return %c0_i32, %c0_i32_0 : i32, i32
  }
  func.func @transform_37(%arg0: i32) -> (i32, i32) {
    %c0_i32 = arith.constant 0 : i32
    %c0_i32_0 = arith.constant 0 : i32
    %c0_i32_1 = arith.constant 0 : i32
    return %c0_i32, %c0_i32_0 : i32, i32
  }
  func.func @transform_38(%arg0: i32) -> i32 {
    %c0_i32 = arith.constant 0 : i32
    %c0_i32_0 = arith.constant 0 : i32
    return %c0_i32 : i32
  }
  func.func @transform_39(%arg0: i32) -> i32 {
    %c0_i32 = arith.constant 0 : i32
    %c0_i32_0 = arith.constant 0 : i32
    return %c0_i32 : i32
  }
  func.func @transform_40(%arg0: i32) -> (i32, i32) {
    %c0_i32 = arith.constant 0 : i32
    %c0_i32_0 = arith.constant 0 : i32
    %c0_i32_1 = arith.constant 0 : i32
    return %c0_i32, %c0_i32_0 : i32, i32
  }
  func.func @transform_41(%arg0: i32) -> (i32, i32) {
    %c0_i32 = arith.constant 0 : i32
    %c0_i32_0 = arith.constant 0 : i32
    %c0_i32_1 = arith.constant 0 : i32
    return %c0_i32, %c0_i32_0 : i32, i32
  }
  func.func @transform_42(%arg0: i32) -> i32 {
    %c0_i32 = arith.constant 0 : i32
    %c0_i32_0 = arith.constant 0 : i32
    return %c0_i32 : i32
  }
  func.func @transform_43(%arg0: i32) -> (i32, i32) {
    %c0_i32 = arith.constant 0 : i32
    %c0_i32_0 = arith.constant 0 : i32
    %c0_i32_1 = arith.constant 0 : i32
    return %c0_i32, %c0_i32_0 : i32, i32
  }
  func.func @transform_44(%arg0: i32) -> (i32, i32) {
    %c0_i32 = arith.constant 0 : i32
    %c0_i32_0 = arith.constant 0 : i32
    %c0_i32_1 = arith.constant 0 : i32
    return %c0_i32, %c0_i32_0 : i32, i32
  }
  func.func @transform_45(%arg0: i32) -> (i32, i32) {
    %c0_i32 = arith.constant 0 : i32
    %c0_i32_0 = arith.constant 0 : i32
    %c0_i32_1 = arith.constant 0 : i32
    return %c0_i32, %c0_i32_0 : i32, i32
  }
  func.func @transform_46(%arg0: i32) -> (i32, i32) {
    %c0_i32 = arith.constant 0 : i32
    %c0_i32_0 = arith.constant 0 : i32
    %c0_i32_1 = arith.constant 0 : i32
    return %c0_i32, %c0_i32_0 : i32, i32
  }
  func.func @transform_47(%arg0: i32) -> (i32, i32) {
    %c0_i32 = arith.constant 0 : i32
    %c0_i32_0 = arith.constant 0 : i32
    %c0_i32_1 = arith.constant 0 : i32
    return %c0_i32, %c0_i32_0 : i32, i32
  }
  func.func @transform_48(%arg0: i32) -> (i32, i32) {
    %c0_i32 = arith.constant 0 : i32
    %c0_i32_0 = arith.constant 0 : i32
    %c0_i32_1 = arith.constant 0 : i32
    return %c0_i32, %c0_i32_0 : i32, i32
  }
  func.func @transform_49(%arg0: i32) -> i32 {
    %c0_i32 = arith.constant 0 : i32
    %c0_i32_0 = arith.constant 0 : i32
    return %c0_i32 : i32
  }
  func.func @transform_50(%arg0: i32) -> (i32, i32) {
    %c0_i32 = arith.constant 0 : i32
    %c0_i32_0 = arith.constant 0 : i32
    %c0_i32_1 = arith.constant 0 : i32
    return %c0_i32, %c0_i32_0 : i32, i32
  }
  func.func @transform_51(%arg0: i32) -> (i32, i32) {
    %c0_i32 = arith.constant 0 : i32
    %c0_i32_0 = arith.constant 0 : i32
    %c0_i32_1 = arith.constant 0 : i32
    return %c0_i32, %c0_i32_0 : i32, i32
  }
  func.func @transform_52(%arg0: i32) -> (i32, i32) {
    %c0_i32 = arith.constant 0 : i32
    %c0_i32_0 = arith.constant 0 : i32
    %c0_i32_1 = arith.constant 0 : i32
    return %c0_i32, %c0_i32_0 : i32, i32
  }
  func.func @transform_53(%arg0: i32) -> (i32, i32) {
    %c0_i32 = arith.constant 0 : i32
    %c0_i32_0 = arith.constant 0 : i32
    %c0_i32_1 = arith.constant 0 : i32
    return %c0_i32, %c0_i32_0 : i32, i32
  }
  func.func @transform_54(%arg0: i32) -> (i32, i32) {
    %c0_i32 = arith.constant 0 : i32
    %c0_i32_0 = arith.constant 0 : i32
    return %arg0, %c0_i32 : i32, i32
  }
}

</mosaic_0001>

<bundles_post_ra>
// kernel: tpu_custom_call.1
= control target key start
LH: loop header
LB: loop body
LE: loop exit
PB: predicated region body
PF: predicated region fallthrough
CT: control target
= control target key end

     0   :  { %s2241_s6 = smov 1   ;;  %s2242_s10 = smov 2   ;;  %s2810_s0 = inlined_call_operand.smem [shape: u32[55], index: -1, kind: input, shape index: {}] }
   0x1   :  { %s2318_s5 = sld [smem:[%s2810_s0]]   ;;  %s2243_s14 = smov 3  }
   0x2   :  { %s2323_s9 = sld [smem:[%s2810_s0 + %s2241_s6]]   ;;  %s2244_s18 = smov 4  }
   0x3   :  { %s2328_s13 = sld [smem:[%s2810_s0 + %s2242_s10]]   ;;  %s2245_s22 = smov 5  }
   0x4   :  { %s2333_s17 = sld [smem:[%s2810_s0 + %s2243_s14]]   ;;  %s2246_s26 = smov 6  }
   0x5   :  { %s2338_s21 = sld [smem:[%s2810_s0 + %s2244_s18]]   ;;  %s2247_s30 = smov 7  }
   0x6   :  { %s2343_s25 = sld [smem:[%s2810_s0 + %s2245_s22]]   ;;  %s2248_s4 = smov 8  }
   0x7   :  { %s2348_s29 = sld [smem:[%s2810_s0 + %s2246_s26]]   ;;  %s2249_s10 = smov 9  }
   0x8   :  { %s2353_s3 = sld [smem:[%s2810_s0 + %s2247_s30]]   ;;  %s2250_s15 = smov 10  }
   0x9   :  { %s2358_s8 = sld [smem:[%s2810_s0 + %s2248_s4]]   ;;  %s2251_s20 = smov 11  }
   0xa   :  { %2818 = sst [smem:[#allocation19_spill]] %s2333_s17  ;;  %s2252_s26 = smov 12  }
   0xb   :  { %2819 = sst [smem:[#allocation20_spill]] %s2338_s21  ;;  %s2253_s1 = smov 13  }
   0xc   :  { %2820 = sst [smem:[#allocation21_spill]] %s2343_s25  ;;  %s2254_s7 = smov 14  }
   0xd   :  { %2821 = sst [smem:[#allocation22_spill]] %s2348_s29  ;;  %s2256_s22 = smov 16  }
   0xe   :  { %s2363_s14 = sld [smem:[%s2810_s0 + %s2249_s10]]   ;;  %s2257_s28 = smov 17  }
   0xf   :  { %2822 = sst [smem:[#allocation23_spill]] %s2358_s8 }
  0x10   :  { %s2368_s19 = sld [smem:[%s2810_s0 + %s2250_s15]]   ;;  %s2255_s15 = smov 15  }
  0x11   :  { %s2373_s24 = sld [smem:[%s2810_s0 + %s2251_s20]]  }
  0x12   :  { %s2378_s30 = sld [smem:[%s2810_s0 + %s2252_s26]]  }
  0x13   :  { %s2383_s6 = sld [smem:[%s2810_s0 + %s2253_s1]]  }
  0x14   :  { %2823 = sst [smem:[#allocation24_spill]] %s2363_s14 }
  0x15   :  { %s2388_s12 = sld [smem:[%s2810_s0 + %s2254_s7]]   ;;  %s2258_s7 = smov 18  }
  0x16   :  { %s2393_s20 = sld [smem:[%s2810_s0 + %s2255_s15]]   ;;  %s2259_s15 = smov 19  }
  0x17   :  { %2824 = sst [smem:[#allocation25_spill]] %s2373_s24 }
  0x18   :  { %2825 = sst [smem:[#allocation26_spill]] %s2378_s30 }
  0x19   :  { %2826 = sst [smem:[#allocation27_spill]] %s2383_s6 }
  0x1a   :  { %s2398_s27 = sld [smem:[%s2810_s0 + %s2256_s22]]   ;;  %s2260_s22 = smov 20  }
  0x1b   :  { %s2403_s4 = sld [smem:[%s2810_s0 + %s2257_s28]]   ;;  %s2261_s28 = smov 21  }
  0x1c   :  { %2827 = sst [smem:[#allocation28_spill]] %s2393_s20 }
  0x1d   :  { %s2408_s21 = sld [smem:[%s2810_s0 + %s2258_s7]]   ;;  %s2262_s7 = smov 22  }
  0x1e   :  { %s2413_s25 = sld [smem:[%s2810_s0 + %s2259_s15]]   ;;  %s2263_s15 = smov 23  }
  0x1f   :  { %s2418_s20 = sld [smem:[%s2810_s0 + %s2260_s22]]   ;;  %s2264_s22 = smov 24  }
  0x20   :  { %2828 = sst [smem:[#allocation29_spill]] %s2398_s27 }
  0x21   :  { %2829 = sst [smem:[#allocation30_spill]] %s2403_s4 }
  0x22   :  { %s2423_s8 = sld [smem:[%s2810_s0 + %s2261_s28]]   ;;  %s2265_s28 = smov 25  }
  0x23   :  { %2830 = sst [smem:[#allocation31_spill]] %s2408_s21 }
  0x24   :  { %2831 = sst [smem:[#allocation32_spill]] %s2413_s25 }
  0x25   :  { %2832 = sst [smem:[#allocation33_spill]] %s2418_s20 }
  0x26   :  { %s2428_s17 = sld [smem:[%s2810_s0 + %s2262_s7]]   ;;  %s2266_s7 = smov 26  }
  0x27   :  { %s2433_s6 = sld [smem:[%s2810_s0 + %s2263_s15]]   ;;  %s2267_s15 = smov 27  }
  0x28   :  { %2833 = sst [smem:[#allocation34_spill]] %s2423_s8 }
  0x29   :  { %s2438_s20 = sld [smem:[%s2810_s0 + %s2264_s22]]   ;;  %s2268_s22 = smov 28  }
  0x2a   :  { %s2443_s8 = sld [smem:[%s2810_s0 + %s2265_s28]]   ;;  %s2269_s28 = smov 29  }
  0x2c   :  { %2834 = sst [smem:[#allocation35_spill]] %s2428_s17 }
  0x2d   :  { %2835 = sst [smem:[#allocation36_spill]] %s2433_s6 }
  0x2e   :  { %s2448_s17 = sld [smem:[%s2810_s0 + %s2266_s7]]   ;;  %s2270_s7 = smov 30  }
  0x2f   :  { %2836 = sst [smem:[#allocation37_spill]] %s2438_s20 }
  0x30   :  { %2837 = sst [smem:[#allocation38_spill]] %s2443_s8 }
  0x31   :  { %s2453_s6 = sld [smem:[%s2810_s0 + %s2267_s15]]   ;;  %s2271_s15 = smov 31  }
  0x32   :  { %s2458_s20 = sld [smem:[%s2810_s0 + %s2268_s22]]   ;;  %s2272_s22 = smov 32  }
  0x33   :  { %s2463_s8 = sld [smem:[%s2810_s0 + %s2269_s28]]   ;;  %s2273_s28 = smov 33  }
  0x34   :  { %2838 = sst [smem:[#allocation39_spill]] %s2448_s17 }
  0x35   :  { %s2468_s17 = sld [smem:[%s2810_s0 + %s2270_s7]]   ;;  %s2274_s7 = smov 34  }
  0x37   :  { %2839 = sst [smem:[#allocation40_spill]] %s2453_s6 }
  0x38   :  { %2840 = sst [smem:[#allocation41_spill]] %s2458_s20 }
  0x39   :  { %2841 = sst [smem:[#allocation42_spill]] %s2463_s8 }
  0x3a   :  { %s2473_s6 = sld [smem:[%s2810_s0 + %s2271_s15]]   ;;  %s2275_s15 = smov 35  }
  0x3b   :  { %2842 = sst [smem:[#allocation43_spill]] %s2468_s17 }
  0x3c   :  { %s2478_s20 = sld [smem:[%s2810_s0 + %s2272_s22]]   ;;  %s2276_s22 = smov 36  }
  0x3d   :  { %s2483_s8 = sld [smem:[%s2810_s0 + %s2273_s28]]   ;;  %s2277_s28 = smov 37  }
  0x3e   :  { %s2488_s17 = sld [smem:[%s2810_s0 + %s2274_s7]]   ;;  %s2278_s7 = smov 38  }
  0x40   :  { %2843 = sst [smem:[#allocation44_spill]] %s2473_s6 }
  0x41   :  { %s2493_s6 = sld [smem:[%s2810_s0 + %s2275_s15]]   ;;  %s2279_s15 = smov 39  }
  0x42   :  { %2844 = sst [smem:[#allocation45_spill]] %s2478_s20 }
  0x43   :  { %2845 = sst [smem:[#allocation46_spill]] %s2483_s8 }
  0x44   :  { %2846 = sst [smem:[#allocation47_spill]] %s2488_s17 }
  0x45   :  { %s2498_s20 = sld [smem:[%s2810_s0 + %s2276_s22]]   ;;  %s2280_s22 = smov 40  }
  0x46   :  { %s2503_s8 = sld [smem:[%s2810_s0 + %s2277_s28]]   ;;  %s2281_s28 = smov 41  }
  0x47   :  { %2847 = sst [smem:[#allocation48_spill]] %s2493_s6 }
  0x48   :  { %s2508_s17 = sld [smem:[%s2810_s0 + %s2278_s7]]   ;;  %s2282_s7 = smov 42  }
  0x49   :  { %s2513_s6 = sld [smem:[%s2810_s0 + %s2279_s15]]   ;;  %s2283_s15 = smov 43  }
  0x4a   :  { %s2533_s25 = sld [smem:[%s2810_s0 + %s2283_s15]]   ;;  %s2287_s15 = smov 47  }
  0x4b   :  { %2848 = sst [smem:[#allocation49_spill]] %s2498_s20 }
  0x4c   :  { %2849 = sst [smem:[#allocation50_spill]] %s2503_s8 }
  0x4d   :  { %s2518_s20 = sld [smem:[%s2810_s0 + %s2280_s22]]   ;;  %s2284_s22 = smov 44  }
  0x4e   :  { %2850 = sst [smem:[#allocation51_spill]] %s2508_s17 }
  0x4f   :  { %s2523_s8 = sld [smem:[%s2810_s0 + %s2281_s28]]   ;;  %s2285_s28 = smov 45  }
  0x50   :  { %s2528_s17 = sld [smem:[%s2810_s0 + %s2282_s7]]   ;;  %s2286_s7 = smov 46  }
  0x51   :  { %s2538_s27 = sld [smem:[%s2810_s0 + %s2284_s22]]   ;;  %s2288_s22 = smov 48  }
  0x52   :  { %s2543_s21 = sld [smem:[%s2810_s0 + %s2285_s28]]   ;;  %s2289_s28 = smov 49  }
  0x53   :  { %s2548_s29 = sld [smem:[%s2810_s0 + %s2286_s7]]   ;;  %s2290_s7 = smov 50  }
  0x54   :  { %s2553_s30 = sld [smem:[%s2810_s0 + %s2287_s15]]   ;;  %s2291_s15 = smov 51  }
  0x55   :  { %s2558_s4 = sld [smem:[%s2810_s0 + %s2288_s22]]   ;;  %s2292_s22 = smov 52  }
  0x56   :  { %s2563_s14 = sld [smem:[%s2810_s0 + %s2289_s28]]   ;;  %s2293_s28 = smov 53  }
  0x57   :  { %s2568_s24 = sld [smem:[%s2810_s0 + %s2290_s7]]   ;;  %s2294_s7 = smov 54  }
  0x5a   :  { %2851 = sst [smem:[#allocation52_spill]] %s2553_s30 }
  0x5b   :  { %2852 = sst [smem:[#allocation53_spill]] %s2558_s4 }
  0x5c   :  { %2853 = sst [smem:[#allocation54_spill]] %s2563_s14 }
  0x5d   :  { %2854 = sst [smem:[#allocation55_spill]] %s2568_s24 }
  0x5e   :  { %s2573_s30 = sld [smem:[%s2810_s0 + %s2291_s15]]  }
  0x5f   :  { %s2578_s4 = sld [smem:[%s2810_s0 + %s2292_s22]]  }
  0x60   :  { %s2583_s14 = sld [smem:[%s2810_s0 + %s2293_s28]]  }
  0x61   :  { %s2588_s24 = sld [smem:[%s2810_s0 + %s2294_s7]]  }
  0x62   :  { %125 = vsyncpa [#allocation15], 0 }
  0x63   :  { %126 = vsyncpa [#allocation14], 0  ;;  %s211_s15 = sshll.u32 %s2513_s6, 4  ;;  %s212_s15 = int_to_ptr.vmem [resolvable:$true] %s211_s15 }
  0x64   :  { %s2203_s16 = scalar_lea.vmem %s212_s15, 16  ;;  %p2208_p1 = scmp.lt.s32.totalorder %s212_s15, %s212_s15 }
  0x65   :  { %p2204_p0 = scmp.ne.s32.totalorder %s212_s15, %s2203_s16  ;;  %p2209_p2 = scmp.lt.s32.totalorder %s2203_s16, %s2203_s16 }
  0x67   :  { %p2210_p3 = por %p2209_p2, %p2208_p1 }
  0x69   :  { %p2211_p4 = pnand %p2210_p3, %p2204_p0 }
  0x6b   :  { %2214 = shalt.err (!%p2211_p4)
}
  0x6c   :  { %s2295_s18 = smov [#allocation13]  }
  0x6d   :  { %214 = dma.vmem_to_smem %s212_s15, 16, %s2295_s18, [#allocation15]  }
  0x6e   :  { %2237 = dma.done.wait [#allocation15], 16  }
  0x6f   :  { %2238 = vsyncadd [#allocation15], 4294967280 }
  0x70   :  { %246 = sfence }
  0x71   :  { %v248_v0 = vld [vmem:[%s2318_s5] sm:$0xff]  ;;  %vm249_vm0 = vcmask 130048   ;;  %v2296_v9 = vmov 0   ;;  %v2297_v18 = vmov 0.0   ;;  %vm2298_vm1 = vmmov 0   ;;  %v2145_v28 = vld [vmem:[%s2548_s29 + $0x8] sm:$0xff]  }
  0x72   :  { %v250_v1 = vsel %vm249_vm0, %v248_v0, 0.0  ;;  %v2140_v7 = vld [vmem:[%s2323_s9 + $0x4] ss:$8 sps:$4 sm:$0xff]   ;;  %v2142_v8 = vld [vmem:[%s2323_s9] ss:$8 sps:$4 sm:$0xff]   ;;  %313 = vmatprep.mubr.bf16.mxu0 %v2296_v9  ;;  %1943 = vmatprep.subr.bf16.mxu1 %v2297_v18  ;;  %v323_v19 = vstv %s2528_s17  ;;  %vm412_vm3 = vcmask 261120  }
  0x73   :  { %251 = vadd.xlane.f32.xlu0 %v250_v1  ;;  %281 = vmatprep.subr.bf16.mxu0 %v2140_v7  ;;  %v2143_v17 = vld [vmem:[%s2543_s21] sm:$0xff]   ;;  %vm458_vm4 = vcmask 64512   ;;  %vm492_vm5 = vcmask 1043456   ;;  %s2299_s0 = smov 32   ;;  %s2855_s5 = sld [smem:[#allocation54_spill]]  ;;  %v781_v7 = vstv %s2388_s12  ;;  %vm565_vm6 = vcmask 195584  }
  0x74   :  { %282 = vmatpush1.bf16.msra.mxu0 %v2142_v8  ;;  %1945 = vmatprep.mubr.msk.bf16.mxu1 %vm2298_vm1, %v2297_v18  ;;  %v2144_v27 = vld [vmem:[%s2548_s29] sm:$0xff]   ;;  %s2856_s9 = sld [smem:[#allocation25_spill]]  ;;  %s2857_s17 = sld [smem:[#allocation24_spill]]  ;;  %vm626_vm7 = vcmask 1041408   ;;  %vm809_vm8 = vcmask 1044480   ;;  %vm622_vm9 = vcmask 31744  }
  0x75   :  { %1944 = vmatpush3.bf16.msra.mxu1 %v2143_v17  ;;  %1949 = vmatprep.subr.bf16.mxu0 %v2297_v18  ;;  %v1824_v29 = vld [vmem:[%s2518_s20] ss:$0 sm:$0xff]  ;;  %s2301_s21 = smov 72   ;;  %s2858_s29 = sld [smem:[#allocation30_spill]]  ;;  %vm805_vm10 = vcmask 203776   ;;  %vm869_vm11 = vcmask 1042432  }
  0x76   :  { %1957 = vmatprep.subr.bf16.mxu1 %v2297_v18  ;;  %v1827_v38 = vld [vmem:[%s2523_s8] ss:$0 sm:$0xff]  ;;  %s2860_s8 = sld [smem:[#allocation22_spill]]  ;;  %s2862_s6 = sld [smem:[#allocation29_spill]]  ;;  %vm865_vm13 = vcmask 39936  }
  0x77   :  { %v488_v50 = vld [vmem:[%s2328_s13] sm:$0xf]  ;;  %s2300_s13 = smov 96   ;;  %s2863_s12 = sld [smem:[#allocation32_spill]] }
  0x78   :  { %v494_v51 = vsel %vm492_vm5, %v488_v50, 0  ;;  %v1831_v56 = vld [vmem:[%s2538_s27] ss:$0 sm:$0xff]  ;;  %s2864_s20 = sld [smem:[#allocation27_spill]]  ;;  %s2865_s27 = sld [smem:[#allocation52_spill]] }
  0x79   :  { %v1832_v58 = vld [vmem:[%s2533_s25] ss:$0 sm:$0xff]  ;;  %s2302_s25 = smov 112   ;;  %s2868_s22 = sld [smem:[#allocation55_spill]] }
  0x7a   :  { %s2869_s23 = sld [smem:[#allocation39_spill]]  ;;  %s2870_s26 = sld [smem:[#allocation36_spill]] }
  0x7b   :  { %s2871_s28 = sld [smem:[#allocation43_spill]]  ;;  %s2304_s1 = smov 81  }
  0x7c   :  { %s2873_s2 = sld [smem:[#allocation28_spill]]  ;;  %s2305_s7 = smov 47  }
  0x7d   :  { %s2306_s10 = smov 23   ;;  %s2874_s11 = sld [smem:[#allocation40_spill]] }
  0x7e   :  { %s2875_s15 = sld [smem:[#allocation38_spill]]  ;;  %s2877_s18 = sld [smem:[#allocation41_spill]] }
  0x7f   :  { %s2876_s16 = sld [smem:[#allocation46_spill]] }
 0x100   :  { %v252_v2 = vpop.xlane.xlu0 %251 }
 0x101   :  { %v2593_v3 = vmul.f32 0.0625, %v252_v2  ;;  %v2146_v2 = vld [vmem:[%s2368_s19] sm:$0xff]  }
 0x103   :  { %v255_v4 = vsub.f32 %v248_v0, %v2593_v3 }
 0x105   :  { %v256_v5 = vmul.f32 %v255_v4, %v255_v4 }
 0x107   :  { %v257_v6 = vsel %vm249_vm0, %v256_v5, 0.0 }
 0x108   :  { %258 = vadd.xlane.f32.xlu0 %v257_v6  ;;  %v544_v6 = vstv %s2353_s3  ;;  %s2859_s3 = sld [smem:[#allocation26_spill]] }
 0x195   :  { %v259_v10 = vpop.xlane.xlu0 %258 }
 0x196   :  { %v260_v11 = vmul.f32 0.0625, %v259_v10 }
 0x198   :  { %v261_v12 = vadd.f32 1e-05, %v260_v11 }
 0x19a   :  { %2165 = vrsqrt.f32 %v261_v12 }
 0x1a4   :  { %v2166_v13 = vpop.eup %2165 }
 0x1a5   :  { %v2599_v14 = vmul.f32 %v2166_v13, %v261_v12  ;;  %v263_v15 = vmul.f32 %v2166_v13, %v255_v4  ;;  %v2147_v4 = vld [vmem:[%s2368_s19 + $0x8] ss:$0 sps:$4 sm:$0xff]   ;;  %v1013_v12 = vstv %s2855_s5  ;;  %s2861_s19 = sld [smem:[#allocation31_spill]] }
 0x1a6   :  { %v570_v5 = vsel %vm492_vm5, %v2147_v4, 0  ;;  %v2153_v4 = vld [vmem:[%s2863_s12] sm:$0xff]   ;;  %s2879_s5 = sld [smem:[#allocation47_spill]] }
 0x1a7   :  { %v265_v16 = vpack.c.bf16 %v263_v15, %v263_v15 }
 0x1a9   :  { %1823 = vmatmul.mubr.msk.bf16.vlgmr.msra.gmra.mrb[0].mxu0 %vm249_vm0, %v265_v16 }
 0x1aa   :  { %1953 = vmatprep.mubr.msk.bf16.mxu0 %vm2298_vm1, %v2297_v18  ;;  %1950 = vmatpush3.bf16.msra.mxu0 %v2144_v27  ;;  %v552_v27 = vstv %s2857_s17  ;;  %s2882_s17 = sld [smem:[#allocation37_spill]] }
 0x1ab   :  { %1951 = vmatprep.subr.bf16.mxu0 %v2297_v18  ;;  %v857_v50 = vld [vmem:[%s2861_s19] sm:$0x7]  ;;  %s2887_s19 = sld [smem:[#allocation34_spill]] }
 0x1ae   :  { %1952 = vmatpush3.bf16.msra.mxu0 %v2145_v28 }
 0x1af   :  { %1963 = vmatprep.subr.bf16.mxu0 %v2297_v18 }
 0x27c   :  { %v2611_v20 = vpop.f32.mrb[0].mxu0 }
 0x27d   :  { %v324_v21 = vadd.f32 %v323_v19, %v2611_v20  ;;  %v2614_v22 = vpop.f32.mrb[1].mxu0  ;;  %v1014_v13 = vadd.f32 %v1013_v12, %v2611_v20 }
 0x27e   :  { %v319_v23 = vpop.f32.mrb[2].mxu0 }
 0x27f   :  { %2167 = vtanh.f32 %v324_v21  ;;  %v320_v24 = vpop.f32.mrb[3].mxu0 }
 0x289   :  { %v2168_v25 = vpop.eup %2167 }
 0x28a   :  { %v326_v26 = vpack.c.bf16 %v2168_v25, %v2168_v25  ;;  %v614_v25 = vld [vmem:[%s2856_s9] sm:$0x3]  ;;  %s2880_s9 = sld [smem:[#allocation45_spill]] }
 0x28c   :  { %1946 = vmatmul.mubr.msk.bf16.vlgmr.msra.gmra.mrb[0].mxu1 %vm249_vm0, %v326_v26  ;;  %v628_v26 = vsel %vm626_vm7, %v614_v25, 0 }
 0x28d   :  { %1959 = vmatprep.mubr.msk.bf16.mxu1 %vm2298_vm1, %v2297_v18  ;;  %1958 = vmatpush3.bf16.msra.mxu1 %v494_v51 }
 0x28e   :  { %1971 = vmatprep.subr.bf16.mxu1 %v2297_v18 }
 0x35f   :  { %v379_v30 = vpop.f32.mrb[0].mxu1 }
 0x360   :  { %v380_v31 = vadd.f32 %v1824_v29, %v379_v30  ;;  %v1947_v32 = vpop.f32.mrb[1].mxu1 }
 0x361   :  { %v382_v33 = vpop.f32.mrb[2].mxu1 }
 0x362   :  { %vm385_vm2 = vcmp.gt.f32.partialorder %v380_v31, 0.0  ;;  %v386_v34 = vmul.f32 0.01, %v380_v31  ;;  %v1948_v35 = vpop.f32.mrb[3].mxu1  ;;  %v2303_v33 = vmov 65535  }
 0x364   :  { %v387_v36 = vsel %vm385_vm2, %v380_v31, %v386_v34  ;;  %v810_v34 = vsel %vm492_vm5, 4294967295, %v2303_v33 }
 0x365   :  { %v388_v37 = vpack.c.bf16 %v387_v36, %v387_v36  ;;  %v2148_v36 = vld [vmem:[%s2858_s29] sm:$0xff]  }
 0x367   :  { %1954 = vmatmul.mubr.msk.bf16.vlgmr.msra.gmra.mrb[4].mxu0 %vm412_vm3, %v388_v37  ;;  %v2149_v37 = vld [vmem:[%s2858_s29 + $0x8] sm:$0x1f]   ;;  %s2884_s29 = sld [smem:[#allocation44_spill]] }
 0x368   :  { %1967 = vmatprep.mubr.msk.bf16.mxu0 %vm2298_vm1, %v2297_v18  ;;  %1964 = vmatpush3.bf16.msra.mxu0 %v2146_v2 }
 0x369   :  { %1965 = vmatprep.subr.bf16.mxu0 %v2297_v18 }
 0x36c   :  { %1966 = vmatpush3.bf16.msra.mxu0 %v570_v5  ;;  %v2154_v5 = vld [vmem:[%s2863_s12 + $0x8] sm:$0xff]   ;;  %s1845_s12 = sld [smem:[#allocation13 + $0x4]] }
 0x36d   :  { %1977 = vmatprep.subr.bf16.mxu0 %v2297_v18 }
 0x43a   :  { %v450_v39 = vpop.f32.mrb[4].mxu0 }
 0x43b   :  { %v451_v40 = vadd.f32 %v1827_v38, %v450_v39  ;;  %v1955_v41 = vpop.f32.mrb[5].mxu0  ;;  %v2659_v39 = vsel %vm809_vm8, %v810_v34, 0 }
 0x43c   :  { %v453_v42 = vpop.f32.mrb[6].mxu0 }
 0x43d   :  { %v1956_v43 = vpop.f32.mrb[7].mxu0  ;;  %v459_v44 = vsel %vm458_vm4, %v451_v40, 0.0  ;;  %v2150_v42 = vld [vmem:[%s2859_s3] sm:$0xff]  }
 0x43e   :  { %460 = vadd.xlane.f32.xlu1 %v459_v44  ;;  %v2151_v43 = vld [vmem:[%s2859_s3 + $0x8] sm:$0xff]   ;;  %v1837_v44 = vld [vmem:[%s2860_s8] ss:$0 sm:$0xff]  ;;  %s2885_s3 = sld [smem:[#allocation21_spill]]  ;;  %s2886_s8 = sld [smem:[#allocation20_spill]] }
 0x4cb   :  { %v461_v45 = vpop.xlane.xlu1 %460 }
 0x4cc   :  { %v463_v46 = vmul.f32 0.125, %v461_v45  ;;  %v870_v45 = vsel %vm626_vm7, 4294967295, %v2303_v33 }
 0x4cd   :  { %v2677_v51 = vsel %vm869_vm11, %v870_v45, 0 }
 0x4ce   :  { %v464_v47 = vsub.f32 %v451_v40, %v463_v46  ;;  %v813_v40 = vand.u32 %v2149_v37, %v2659_v39 }
 0x4d0   :  { %v465_v48 = vmul.f32 %v464_v47, %v464_v47 }
 0x4d2   :  { %v466_v49 = vsel %vm458_vm4, %v465_v48, 0.0 }
 0x4d3   :  { %467 = vadd.xlane.f32.xlu1 %v466_v49 }
 0x560   :  { %v468_v52 = vpop.xlane.xlu1 %467 }
 0x561   :  { %v469_v53 = vmul.f32 0.125, %v468_v52 }
 0x563   :  { %v470_v54 = vadd.f32 1e-05, %v469_v53 }
 0x565   :  { %2169 = vrsqrt.f32 %v470_v54 }
 0x56f   :  { %v2170_v55 = vpop.eup %2169 }
 0x570   :  { %v472_v57 = vmul.f32 %v2170_v55, %v464_v47  ;;  %v873_v55 = vand.u32 %v2677_v51, %v857_v50 }
 0x572   :  { %v479_v59 = vmul.f32 %v1831_v56, %v472_v57  ;;  %v790_v57 = vstv %s2862_s6  ;;  %s2888_s6 = sld [smem:[#allocation33_spill]] }
 0x574   :  { %v486_v60 = vadd.f32 %v1832_v58, %v479_v59 }
 0x576   :  { %v487_v61 = vpack.c.bf16 %v486_v60, %v486_v60 }
 0x578   :  { %1960 = vmatmul.mubr.msk.bf16.vlgmr.msra.gmra.mrb[4].mxu1 %vm458_vm4, %v487_v61 }
 0x579   :  { %1973 = vmatprep.mubr.msk.bf16.mxu1 %vm2298_vm1, %v2297_v18  ;;  %1972 = vmatpush3.bf16.msra.mxu1 %v628_v26 }
 0x57a   :  { %1985 = vmatprep.subr.bf16.mxu1 %v2297_v18 }
 0x64b   :  { %v530_v62 = vpop.f32.mrb[4].mxu1 }
 0x64c   :  { %539 = vrot.lane.b32.xlu0 %v530_v62, %s2299_s0  ;;  %v1961_v63 = vpop.f32.mrb[5].mxu1  ;;  %s2878_s0 = sld [smem:[#allocation35_spill]] }
 0x64d   :  { %v533_v0 = vpop.f32.mrb[6].mxu1 }
 0x64e   :  { %v1962_v1 = vpop.f32.mrb[7].mxu1  ;;  %v2152_v0 = vld [vmem:[%s2578_s4] sm:$0xff]   ;;  %s2866_s4 = sld [smem:[#allocation53_spill]] }
 0x6be   :  { %v540_v8 = vpop.permute.xlu0 %539 }
 0x6bf   :  { %v542_v9 = vadd.f32 %v540_v8, %v2611_v20 }
 0x6c1   :  { %v545_v10 = vadd.f32 %v544_v6, %v542_v9  ;;  %v782_v11 = vadd.f32 %v781_v7, %v542_v9 }
 0x6c3   :  { %2171 = vtanh.f32 %v545_v10  ;;  %v1850_v10 = vld [vmem:[%s2864_s20] ss:$0 sm:$0xff]  ;;  %s1857_s20 = sld [smem:[#allocation13 + $0x5]] }
 0x6c4   :  { %2173 = vtanh.f32 %v782_v11 }
 0x6c5   :  { %2175 = vtanh.f32 %v1014_v13 }
 0x6cd   :  { %v2172_v15 = vpop.eup %2171 }
 0x6ce   :  { %v547_v16 = vpack.c.bf16 %v2172_v15, %v2172_v15  ;;  %v2174_v17 = vpop.eup %2173 }
 0x6cf   :  { %v784_v19 = vpack.c.bf16 %v2174_v17, %v2174_v17  ;;  %v2176_v21 = vpop.eup %2175 }
 0x6d0   :  { %554 = vrot.lane.b32.xlu1 %v547_v16, %s2300_s13  ;;  %v1016_v23 = vpack.c.bf16 %v2176_v21, %v2176_v21  ;;  %v2155_v21 = vld [vmem:[%s2583_s14] sm:$0xff]   ;;  %s2881_s13 = sld [smem:[#allocation48_spill]] }
 0x6d4   :  { %792 = vrot.lane.b32.xlu1 %v784_v19, %s2301_s21  ;;  %s2883_s21 = sld [smem:[#allocation42_spill]] }
 0x6d8   :  { %1027 = vrot.lane.b32.xlu1 %v1016_v23, %s2302_s25 }
 0x742   :  { %v555_v24 = vpop.permute.xlu1 %554 }
 0x743   :  { %1968 = vmatmul.mubr.msk.bf16.vlgmr.msra.gmra.mrb[8].mxu0 %vm565_vm6, %v555_v24  ;;  %v1859_v24 = vld [vmem:[%s2865_s27] ss:$0 sm:$0xff]  ;;  %s1881_s27 = sld [smem:[#allocation13 + $0x6]] }
 0x744   :  { %1981 = vmatprep.mubr.msk.bf16.mxu0 %vm2298_vm1, %v2297_v18  ;;  %1978 = vmatpush3.bf16.msra.mxu0 %v2150_v42 }
 0x745   :  { %1979 = vmatprep.subr.bf16.mxu0 %v2297_v18 }
 0x746   :  { %v793_v41 = vpop.permute.xlu1 %792 }
 0x748   :  { %1980 = vmatpush3.bf16.msra.mxu0 %v2151_v43 }
 0x749   :  { %1993 = vmatprep.subr.bf16.mxu0 %v2297_v18 }
 0x74a   :  { %v1028_v2 = vpop.permute.xlu1 %1027 }
 0x816   :  { %v606_v28 = vpop.f32.mrb[8].mxu0 }
 0x817   :  { %v607_v29 = vadd.f32 %v606_v28, %v552_v27  ;;  %v1969_v30 = vpop.f32.mrb[9].mxu0  ;;  %v2156_v28 = vld [vmem:[%s2583_s14 + $0x8] sm:$0xff]   ;;  %s2867_s14 = sld [smem:[#allocation19_spill]] }
 0x818   :  { %v609_v31 = vpop.f32.mrb[10].mxu0 }
 0x819   :  { %2177 = vtanh.f32 %v607_v29  ;;  %v1970_v32 = vpop.f32.mrb[11].mxu0 }
 0x823   :  { %v2178_v35 = vpop.eup %2177 }
 0x824   :  { %v613_v38 = vpack.c.bf16 %v2178_v35, %v2178_v35 }
 0x826   :  { %1974 = vmatmul.mubr.msk.bf16.vlgmr.msra.gmra.mrb[8].mxu1 %vm622_vm9, %v613_v38  ;;  %v1862_v38 = vld [vmem:[%s2866_s4] ss:$0 sm:$0xff]  ;;  %s1846_s4 = sld [smem:[#allocation13 + $0x8]] }
 0x827   :  { %1986 = vmatpush3.bf16.msra.mxu1 %v2148_v36  ;;  %1989 = vmatprep.mubr.msk.bf16.mxu1 %vm2298_vm1, %v2297_v18 }
 0x828   :  { %1987 = vmatprep.subr.bf16.mxu1 %v2297_v18 }
 0x82b   :  { %1988 = vmatpush3.bf16.msra.mxu1 %v813_v40 }
 0x82c   :  { %1999 = vmatprep.subr.bf16.mxu1 %v2297_v18 }
 0x82e   :  { %1990 = vmatmul.mubr.msk.bf16.vlgmr.msra.gmra.mrb[12].mxu1 %vm805_vm10, %v793_v41 }
 0x82f   :  { %2003 = vmatprep.mubr.msk.bf16.mxu1 %vm2298_vm1, %v2297_v18  ;;  %2000 = vmatpush3.bf16.msra.mxu1 %v2153_v4 }
 0x830   :  { %2001 = vmatprep.subr.bf16.mxu1 %v2297_v18 }
 0x833   :  { %2002 = vmatpush3.bf16.msra.mxu1 %v2154_v5  ;;  %v2157_v5 = vld [vmem:[%s2869_s23] sm:$0xff]  }
 0x834   :  { %2013 = vmatprep.subr.bf16.mxu1 %v2297_v18 }
 0x8f9   :  { %v664_v46 = vpop.f32.mrb[8].mxu1 }
 0x8fa   :  { %v665_v47 = vadd.f32 %v1837_v44, %v664_v46  ;;  %v1975_v48 = vpop.f32.mrb[9].mxu1 }
 0x8fb   :  { %v667_v49 = vpop.f32.mrb[10].mxu1 }
 0x8fc   :  { %vm670_vm12 = vcmp.gt.f32.partialorder %v665_v47, 0.0  ;;  %v671_v52 = vmul.f32 0.01, %v665_v47  ;;  %v1976_v53 = vpop.f32.mrb[11].mxu1 }
 0x8fe   :  { %v672_v54 = vsel %vm670_vm12, %v665_v47, %v671_v52  ;;  %v1178_v52 = vld [vmem:[%s2867_s14] sm:$0xf]  ;;  %s768_s14 = sld [smem:[#allocation13]] }
 0x8ff   :  { %v673_v56 = vpack.c.bf16 %v672_v54, %v672_v54  ;;  %v1183_v53 = vsel %vm492_vm5, %v1178_v52, 0 }
 0x901   :  { %1982 = vmatmul.mubr.msk.bf16.vlgmr.msra.gmra.mrb[12].mxu0 %vm412_vm3, %v673_v56  ;;  %v849_v58 = vpop.f32.mrb[12].mxu1 }
 0x902   :  { %v850_v59 = vadd.f32 %v849_v58, %v790_v57  ;;  %v1991_v60 = vpop.f32.mrb[13].mxu1  ;;  %1994 = vmatpush3.bf16.msra.mxu0 %v873_v55  ;;  %1995 = vmatprep.mubr.msk.bf16.mxu0 %vm2298_vm1, %v2297_v18  ;;  %v1866_v58 = vld [vmem:[%s2573_s30] ss:$0 sm:$0xff]  ;;  %s2872_s30 = sld [smem:[#allocation23_spill]] }
 0x903   :  { %v852_v61 = vpop.f32.mrb[14].mxu1  ;;  %2007 = vmatprep.subr.bf16.mxu0 %v2297_v18  ;;  %v1867_v60 = vld [vmem:[%s2868_s22] ss:$0 sm:$0xff]  ;;  %s1858_s22 = sld [smem:[#allocation13 + $0x9]] }
 0x904   :  { %2179 = vtanh.f32 %v850_v59  ;;  %v1992_v62 = vpop.f32.mrb[15].mxu1 }
 0x90e   :  { %v2180_v63 = vpop.eup %2179 }
 0x90f   :  { %v856_v1 = vpack.c.bf16 %v2180_v63, %v2180_v63 }
 0x911   :  { %1996 = vmatmul.mubr.msk.bf16.vlgmr.msra.gmra.mrb[16].mxu0 %vm865_vm13, %v856_v1 }
 0x912   :  { %2008 = vmatpush3.bf16.msra.mxu0 %v2152_v0  ;;  %2009 = vmatprep.mubr.msk.bf16.mxu0 %vm2298_vm1, %v2297_v18 }
 0x913   :  { %2021 = vmatprep.subr.bf16.mxu0 %v2297_v18 }
 0x919   :  { %2010 = vmatmul.mubr.msk.bf16.vlgmr.msra.gmra.mrb[20].mxu0 %vm249_vm0, %v1028_v2  ;;  %vm1486_vm0 = vcmask 187392  }
 0x91a   :  { %2023 = vmatprep.mubr.msk.bf16.mxu0 %vm2298_vm1, %v2297_v18  ;;  %2022 = vmatpush3.bf16.msra.mxu0 %v1183_v53 }
 0x91b   :  { %2035 = vmatprep.subr.bf16.mxu0 %v2297_v18 }
 0x9d4   :  { %v2697_v6 = vpop.f32.mrb[12].mxu0 }
 0x9d5   :  { %v1983_v7 = vpop.f32.mrb[13].mxu0 }
 0x9d6   :  { %v737_v8 = vpop.f32.mrb[14].mxu0  ;;  %v2158_v7 = vld [vmem:[%s2869_s23 + $0x8] ss:$0 sps:$4 sm:$0xff]   ;;  %s1882_s23 = sld [smem:[#allocation13 + $0xa]] }
 0x9d7   :  { %v1984_v9 = vpop.f32.mrb[15].mxu0  ;;  %v1258_v8 = vsel %vm492_vm5, %v2158_v7, 0 }
 0x9d8   :  { %v1233_v9 = vstv %s2870_s26  ;;  %s1856_s26 = sld [smem:[#allocation13 + $0x1]] }
 0x9e4   :  { %v909_v11 = vpop.f32.mrb[16].mxu0 }
 0x9e5   :  { %v910_v12 = vadd.f32 %v1850_v10, %v909_v11  ;;  %v1997_v13 = vpop.f32.mrb[17].mxu0  ;;  %v1467_v10 = vstv %s2871_s28  ;;  %s1880_s28 = sld [smem:[#allocation13 + $0x2]] }
 0x9e6   :  { %v912_v15 = vpop.f32.mrb[18].mxu0 }
 0x9e7   :  { %vm915_vm14 = vcmp.gt.f32.partialorder %v910_v12, 0.0  ;;  %v916_v16 = vmul.f32 0.01, %v910_v12  ;;  %v1998_v17 = vpop.f32.mrb[19].mxu0 }
 0x9e9   :  { %v917_v19 = vsel %vm915_vm14, %v910_v12, %v916_v16 }
 0x9ea   :  { %v918_v23 = vpack.c.bf16 %v917_v19, %v917_v19 }
 0x9ec   :  { %2004 = vmatmul.mubr.msk.bf16.vlgmr.msra.gmra.mrb[16].mxu1 %vm412_vm3, %v918_v23  ;;  %v1072_v25 = vpop.f32.mrb[20].mxu0 }
 0x9ed   :  { %v1073_v26 = vadd.f32 %v1859_v24, %v1072_v25  ;;  %2014 = vmatpush3.bf16.msra.mxu1 %v2155_v21  ;;  %v2011_v27 = vpop.f32.mrb[21].mxu0  ;;  %2017 = vmatprep.mubr.msk.bf16.mxu1 %vm2298_vm1, %v2297_v18 }
 0x9ee   :  { %v1075_v29 = vpop.f32.mrb[22].mxu0  ;;  %2015 = vmatprep.subr.bf16.mxu1 %v2297_v18 }
 0x9ef   :  { %vm1078_vm15 = vcmp.gt.f32.partialorder %v1073_v26, 0.0  ;;  %v1079_v30 = vmul.f32 0.01, %v1073_v26  ;;  %v2012_v31 = vpop.f32.mrb[23].mxu0 }
 0x9f1   :  { %v1080_v32 = vsel %vm1078_vm15, %v1073_v26, %v1079_v30  ;;  %2016 = vmatpush3.bf16.msra.mxu1 %v2156_v28  ;;  %v1852_v28 = vld [vmem:[%s2873_s2] ss:$0 sm:$0xff]  ;;  %s1893_s2 = sld [smem:[#allocation13 + $0x7]] }
 0x9f2   :  { %v1081_v33 = vpack.c.bf16 %v1080_v32, %v1080_v32  ;;  %2027 = vmatprep.subr.bf16.mxu1 %v2297_v18 }
 0x9f4   :  { %2018 = vmatmul.mubr.msk.bf16.vlgmr.msra.gmra.mrb[20].mxu1 %vm412_vm3, %v1081_v33 }
 0x9f5   :  { %2031 = vmatprep.mubr.msk.bf16.mxu1 %vm2298_vm1, %v2297_v18  ;;  %2028 = vmatpush3.bf16.msra.mxu1 %v2157_v5 }
 0x9f6   :  { %2029 = vmatprep.subr.bf16.mxu1 %v2297_v18 }
 0x9f9   :  { %2030 = vmatpush3.bf16.msra.mxu1 %v1258_v8 }
 0x9fa   :  { %2041 = vmatprep.subr.bf16.mxu1 %v2297_v18 }
 0xabf   :  { %v2711_v34 = vpop.f32.mrb[16].mxu1 }
 0xac0   :  { %v2005_v35 = vpop.f32.mrb[17].mxu1  ;;  %v980_v29 = vadd.f32 %v1852_v28, %v2711_v34 }
 0xac1   :  { %v982_v36 = vpop.f32.mrb[18].mxu1 }
 0xac2   :  { %v2006_v37 = vpop.f32.mrb[19].mxu1  ;;  %v985_v30 = vsel %vm565_vm6, %v980_v29, 0.0 }
 0xac3   :  { %v1302_v37 = vld [vmem:[%s2874_s11] sm:$0x3]  ;;  %s2308_s11 = smov 1  }
 0xac7   :  { %v1142_v40 = vpop.f32.mrb[20].mxu1 }
 0xac8   :  { %v1143_v41 = vadd.f32 %v1862_v38, %v1142_v40  ;;  %v2019_v42 = vpop.f32.mrb[21].mxu1  ;;  %v1314_v38 = vsel %vm626_vm7, %v1302_v37, 0  ;;  %v1241_v40 = vstv %s2875_s15  ;;  %s2890_s15 = sld [smem:[#allocation50_spill]] }
 0xac9   :  { %v1145_v43 = vpop.f32.mrb[22].mxu1 }
 0xaca   :  { %v2020_v44 = vpop.f32.mrb[23].mxu1  ;;  %v1150_v45 = vsel %vm458_vm4, %v1143_v41, 0.0 }
 0xacb   :  { %1151 = vadd.xlane.f32.xlu0 %v1150_v45 }
 0xb58   :  { %v1152_v46 = vpop.xlane.xlu0 %1151 }
 0xb59   :  { %v1153_v47 = vmul.f32 0.125, %v1152_v46 }
 0xb5b   :  { %v1154_v48 = vsub.f32 %v1143_v41, %v1153_v47  ;;  %v2159_v47 = vld [vmem:[%s2876_s16] sm:$0xff]  }
 0xb5d   :  { %v1155_v49 = vmul.f32 %v1154_v48, %v1154_v48 }
 0xb5f   :  { %v1156_v50 = vsel %vm458_vm4, %v1155_v49, 0.0 }
 0xb60   :  { %1157 = vadd.xlane.f32.xlu1 %v1156_v50 }
 0xbed   :  { %v1158_v54 = vpop.xlane.xlu1 %1157 }
 0xbee   :  { %v1159_v55 = vmul.f32 0.125, %v1158_v54  ;;  %v2162_v54 = vld [vmem:[%s2877_s18 + $0x8] sm:$0xff]  }
 0xbf0   :  { %v1160_v56 = vadd.f32 1e-05, %v1159_v55  ;;  %v1872_v55 = vld [vmem:[%s2878_s0] ss:$0 sm:$0xff] }
 0xbf2   :  { %2181 = vrsqrt.f32 %v1160_v56 }
 0xbfc   :  { %v2182_v57 = vpop.eup %2181 }
 0xbfd   :  { %v1162_v59 = vmul.f32 %v2182_v57, %v1154_v48  ;;  %v2160_v48 = vld [vmem:[%s2876_s16 + $0x8] sm:$0x1f]   ;;  %s2891_s16 = sld [smem:[#allocation49_spill]] }
 0xbfe   :  { %v1503_v50 = vand.u32 %v2160_v48, %v2659_v39  ;;  %v2161_v39 = vld [vmem:[%s2877_s18] sm:$0xff]   ;;  %s2309_s18 = smov [#allocation16]  }
 0xbff   :  { %v1169_v61 = vmul.f32 %v1866_v58, %v1162_v59  ;;  %s1758_s0 = sshll.u32 %s2309_s18, 4  ;;  %s1759_s0 = int_to_ptr.vmem [resolvable:$true] %s1758_s0 }
 0xc00   :  { %p2220_p6 = scmp.lt.s32.totalorder %s1759_s0, %s1759_s0 }
 0xc01   :  { %v1176_v62 = vadd.f32 %v1867_v60, %v1169_v61  ;;  %v1547_v60 = vld [vmem:[%s2879_s5] sm:$0x7]  ;;  %s2215_s5 = scalar_lea.vmem %s1759_s0, 128 }
 0xc02   :  { %p2216_p5 = scmp.ne.s32.totalorder %s1759_s0, %s2215_s5  ;;  %p2221_p7 = scmp.lt.s32.totalorder %s2215_s5, %s2215_s5 }
 0xc03   :  { %v1177_v63 = vpack.c.bf16 %v1176_v62, %v1176_v62 }
 0xc04   :  { %p2222_p8 = por %p2221_p7, %p2220_p6 }
 0xc05   :  { %2024 = vmatmul.mubr.msk.bf16.vlgmr.msra.gmra.mrb[24].mxu0 %vm458_vm4, %v1177_v63 }
 0xc06   :  { %2037 = vmatprep.mubr.msk.bf16.mxu0 %vm2298_vm1, %v2297_v18  ;;  %2036 = vmatpush3.bf16.msra.mxu0 %v1314_v38  ;;  %p2223_p9 = pnand %p2222_p8, %p2216_p5 }
 0xc07   :  { %2049 = vmatprep.subr.bf16.mxu0 %v2297_v18 }
 0xcd8   :  { %v1219_v0 = vpop.f32.mrb[24].mxu0 }
 0xcd9   :  { %1228 = vrot.lane.b32.xlu0 %v1219_v0, %s2304_s1  ;;  %v2025_v1 = vpop.f32.mrb[25].mxu0  ;;  %v1559_v0 = vand.u32 %v1547_v60, %v2677_v51  ;;  %v2163_v51 = vld [vmem:[%s2881_s13] sm:$0xff]   ;;  %s1894_s1 = sld [smem:[#allocation13 + $0xb]] }
 0xcda   :  { %v1222_v2 = vpop.f32.mrb[26].mxu0 }
 0xcdb   :  { %v2026_v4 = vpop.f32.mrb[27].mxu0  ;;  %v1479_v2 = vstv %s2880_s9 }
 0xd4b   :  { %v1229_v11 = vpop.permute.xlu0 %1228 }
 0xd4c   :  { %v1231_v12 = vadd.f32 %v1229_v11, %v2611_v20  ;;  %v1465_v13 = vadd.f32 %v1229_v11, %v2614_v22  ;;  %v1839_v22 = vld [vmem:[%s2872_s30] ss:$0 sm:$0xff]  ;;  %s1892_s30 = sld [smem:[#allocation13 + $0x3]] }
 0xd4d   :  { %v2735_v26 = vadd.f32 %v1839_v22, %v2697_v6 }
 0xd4e   :  { %v1234_v15 = vadd.f32 %v1233_v9, %v1231_v12  ;;  %v1468_v16 = vadd.f32 %v1467_v10, %v1231_v12  ;;  %v1469_v17 = vadd.f32 %v1467_v10, %v1465_v13  ;;  %v2164_v12 = vld [vmem:[%s2881_s13 + $0x8] sm:$0xff]   ;;  %v1874_v13 = vld [vmem:[%s2882_s17] ss:$0 sm:$0xff] }
 0xd4f   :  { %v740_v27 = vsel %vm565_vm6, %v2735_v26, 0.0 }
 0xd50   :  { %2183 = vtanh.f32 %v1234_v15 }
 0xd51   :  { %2185 = vtanh.f32 %v1468_v16 }
 0xd52   :  { %2187 = vtanh.f32 %v1469_v17 }
 0xd5a   :  { %v2184_v19 = vpop.eup %2183 }
 0xd5b   :  { %v2186_v21 = vpop.eup %2185  ;;  %v1236_v23 = vpack.c.bf16 %v2184_v19, %v2184_v19 }
 0xd5c   :  { %v2188_v24 = vpop.eup %2187  ;;  %v1472_v25 = vpack.c.bf16 %v2186_v21, %v2186_v21 }
 0xd5d   :  { %1243 = vrot.lane.b32.xlu1 %v1236_v23, %s2305_s7  ;;  %v1473_v20 = vpack.c.bf16 %v2188_v24, %v2188_v24  ;;  %v1886_v24 = vld [vmem:[%s2883_s21] ss:$0 sm:$0xff]  ;;  %s2889_s7 = sld [smem:[#allocation51_spill]] }
 0xd5e   :  { %1482 = vrot.lane.b32.xlu0 %v1472_v25, %s2306_s10 }
 0xd61   :  { %1484 = vrot.lane.b32.xlu1 %v1473_v20, %s2306_s10  ;;  %s2307_s10 = smov 127  }
 0xd7d   :  { %741 = vadd.xlane.f32.xlu0 %v740_v27 }
 0xd85   :  { %986 = vadd.xlane.f32.xlu1 %v985_v30 }
 0xdcf   :  { %v1244_v31 = vpop.permute.xlu1 %1243 }
 0xdd0   :  { %2032 = vmatmul.mubr.msk.bf16.vlgmr.msra.gmra.mrb[24].mxu1 %vm565_vm6, %v1244_v31  ;;  %v1483_v52 = vpop.permute.xlu0 %1482 }
 0xdd1   :  { %2045 = vmatprep.mubr.msk.bf16.mxu1 %vm2298_vm1, %v2297_v18  ;;  %2042 = vmatpush3.bf16.msra.mxu1 %v2161_v39 }
 0xdd2   :  { %2043 = vmatprep.subr.bf16.mxu1 %v2297_v18 }
 0xdd3   :  { %v1485_v6 = vpop.permute.xlu1 %1484 }
 0xdd4   :  { %v1487_v53 = vsel %vm1486_vm0, %v1483_v52, %v1485_v6 }
 0xdd5   :  { %2044 = vmatpush3.bf16.msra.mxu1 %v2162_v54 }
 0xdd6   :  { %2057 = vmatprep.subr.bf16.mxu1 %v2297_v18 }
 0xe0a   :  { %v742_v31 = vpop.xlane.xlu0 %741 }
 0xe0b   :  { %v744_v6 = vmul.f32 0.041666668, %v742_v31 }
 0xe12   :  { %v987_v32 = vpop.xlane.xlu1 %986 }
 0xe13   :  { %v988_v33 = vmul.f32 0.041666668, %v987_v32 }
 0xe15   :  { %v2745_v35 = vsub.f32 %v980_v29, %v988_v33  ;;  %v1888_v33 = vld [vmem:[%s2884_s29] ss:$0 sm:$0xff] }
 0xe17   :  { %v990_v36 = vmul.f32 %v2745_v35, %v2745_v35 }
 0xe19   :  { %v991_v34 = vsel %vm565_vm6, %v990_v36, 0.0  ;;  %v745_v36 = vsub.f32 %v2735_v26, %v744_v6 }
 0xe1a   :  { %992 = vadd.xlane.f32.xlu1 %v991_v34 }
 0xea3   :  { %v1294_v41 = vpop.f32.mrb[24].mxu1 }
 0xea4   :  { %v1295_v42 = vadd.f32 %v1294_v41, %v1241_v40  ;;  %v2033_v43 = vpop.f32.mrb[25].mxu1 }
 0xea5   :  { %v1297_v44 = vpop.f32.mrb[26].mxu1 }
 0xea6   :  { %2189 = vtanh.f32 %v1295_v42  ;;  %v2034_v45 = vpop.f32.mrb[27].mxu1 }
 0xea7   :  { %v746_v45 = vmul.f32 %v745_v36, %v745_v36 }
 0xeb0   :  { %v2190_v46 = vpop.eup %2189 }
 0xeb1   :  { %v1301_v49 = vpack.c.bf16 %v2190_v46, %v2190_v46  ;;  %v747_v46 = vsel %vm565_vm6, %v746_v45, 0.0  ;;  %v1687_v45 = vstv %s1892_s30 }
 0xeb3   :  { %2038 = vmatmul.mubr.msk.bf16.vlgmr.msra.gmra.mrb[28].mxu0 %vm622_vm9, %v1301_v49  ;;  %v993_v49 = vpop.xlane.xlu1 %992 }
 0xeb4   :  { %2050 = vmatpush3.bf16.msra.mxu0 %v2159_v47  ;;  %2053 = vmatprep.mubr.msk.bf16.mxu0 %vm2298_vm1, %v2297_v18  ;;  %v994_v26 = vmul.f32 0.041666668, %v993_v49 }
 0xeb5   :  { %2051 = vmatprep.subr.bf16.mxu0 %v2297_v18 }
 0xeb8   :  { %2052 = vmatpush3.bf16.msra.mxu0 %v1503_v50  ;;  %v995_v50 = vadd.f32 1e-05, %v994_v26 }
 0xeb9   :  { %2063 = vmatprep.subr.bf16.mxu0 %v2297_v18 }
 0xebb   :  { %2054 = vmatmul.mubr.msk.bf16.vlgmr.msra.gmra.mrb[32].mxu0 %vm805_vm10, %v1487_v53 }
 0xebc   :  { %2067 = vmatprep.mubr.msk.bf16.mxu0 %vm2298_vm1, %v2297_v18  ;;  %2064 = vmatpush3.bf16.msra.mxu0 %v2163_v51  ;;  %v1005_v51 = vstv %s1857_s20 }
 0xebd   :  { %2065 = vmatprep.subr.bf16.mxu0 %v2297_v18 }
 0xec0   :  { %2066 = vmatpush3.bf16.msra.mxu0 %v2164_v12 }
 0xf86   :  { %v1350_v56 = vpop.f32.mrb[28].mxu0 }
 0xf87   :  { %v1351_v57 = vadd.f32 %v1872_v55, %v1350_v56  ;;  %v2039_v58 = vpop.f32.mrb[29].mxu0 }
 0xf88   :  { %v1353_v59 = vpop.f32.mrb[30].mxu0 }
 0xf89   :  { %vm1356_vm2 = vcmp.gt.f32.partialorder %v1351_v57, 0.0  ;;  %v1357_v61 = vmul.f32 0.01, %v1351_v57  ;;  %v2040_v62 = vpop.f32.mrb[31].mxu0 }
 0xf8b   :  { %v1358_v63 = vsel %vm1356_vm2, %v1351_v57, %v1357_v61 }
 0xf8c   :  { %v1359_v1 = vpack.c.bf16 %v1358_v63, %v1358_v63 }
 0xf8e   :  { %2046 = vmatmul.mubr.msk.bf16.vlgmr.msra.gmra.mrb[28].mxu1 %vm412_vm3, %v1359_v1  ;;  %v1539_v4 = vpop.f32.mrb[32].mxu0 }
 0xf8f   :  { %v1540_v5 = vadd.f32 %v1539_v4, %v1479_v2  ;;  %v2055_v7 = vpop.f32.mrb[33].mxu0  ;;  %2058 = vmatpush3.bf16.msra.mxu1 %v1559_v0  ;;  %2059 = vmatprep.mubr.msk.bf16.mxu1 %vm2298_vm1, %v2297_v18  ;;  %v1843_v0 = vld [vmem:[%s2885_s3] ss:$0 sm:$0xff] }
 0xf90   :  { %v1542_v8 = vpop.f32.mrb[34].mxu0  ;;  %v1844_v4 = vld [vmem:[%s2886_s8] ss:$0 sm:$0xff] }
 0xf91   :  { %2191 = vtanh.f32 %v1540_v5  ;;  %v2056_v9 = vpop.f32.mrb[35].mxu0 }
 0xf92   :  { %2193 = vrsqrt.f32 %v995_v50 }
 0xf9b   :  { %v2192_v10 = vpop.eup %2191 }
 0xf9c   :  { %v1546_v11 = vpack.c.bf16 %v2192_v10, %v2192_v10  ;;  %v2194_v61 = vpop.eup %2193  ;;  %v1878_v10 = vld [vmem:[%s2887_s19] ss:$0 sm:$0xff] }
 0xf9d   :  { %v997_v63 = vmul.f32 %v2194_v61, %v2745_v35  ;;  %v1713_v61 = vstv %s2889_s7 }
 0xf9e   :  { %2060 = vmatmul.mubr.msk.bf16.vlgmr.msra.gmra.mrb[32].mxu1 %vm865_vm13, %v1546_v11  ;;  %v773_v11 = vstv %s1845_s12 }
 0xf9f   :  { %v998_v1 = vmul.f32 %v1843_v0, %v997_v63 }
 0xfa1   :  { %v999_v8 = vadd.f32 %v1844_v4, %v998_v1 }
0x1061   :  { %v1420_v15 = vpop.f32.mrb[28].mxu1 }
0x1062   :  { %v1421_v16 = vadd.f32 %v1874_v13, %v1420_v15  ;;  %v2047_v17 = vpop.f32.mrb[29].mxu1  ;;  %v1879_v15 = vld [vmem:[%s2888_s6] ss:$0 sm:$0xff] }
0x1063   :  { %v1423_v19 = vpop.f32.mrb[30].mxu1  ;;  %v1006_v17 = vmul.f32 %v1005_v51, %v999_v8  ;;  %v1895_v51 = vld [vmem:[%s2890_s15] ss:$0 sm:$0xff] }
0x1064   :  { %v2048_v21 = vpop.f32.mrb[31].mxu1  ;;  %v1426_v23 = vsel %vm565_vm6, %v1421_v16, 0.0  ;;  %v1458_v19 = vstv %s1881_s27 }
0x1065   :  { %1427 = vadd.xlane.f32.xlu0 %v1426_v23 }
0x1071   :  { %v1595_v25 = vpop.f32.mrb[32].mxu1 }
0x1072   :  { %v1596_v20 = vadd.f32 %v1886_v24, %v1595_v25  ;;  %v2061_v22 = vpop.f32.mrb[33].mxu1 }
0x1073   :  { %v1598_v27 = vpop.f32.mrb[34].mxu1 }
0x1074   :  { %vm1601_vm1 = vcmp.gt.f32.partialorder %v1596_v20, 0.0  ;;  %v1602_v28 = vmul.f32 0.01, %v1596_v20  ;;  %v2062_v18 = vpop.f32.mrb[35].mxu1 }
0x1075   :  { %v769_v18 = vstv %s768_s14 }
0x1076   :  { %v1603_v29 = vsel %vm1601_vm1, %v1596_v20, %v1602_v28  ;;  %v777_v28 = vstv %s1846_s4 }
0x1077   :  { %v1604_v30 = vpack.c.bf16 %v1603_v29, %v1603_v29  ;;  %v1009_v29 = vstv %s1858_s22 }
0x1079   :  { %2068 = vmatmul.mubr.msk.bf16.vlgmr.msra.gmra.mrb[36].mxu0 %vm412_vm3, %v1604_v30  ;;  %v1462_v30 = vstv %s1882_s23  ;;  %vm1702_vm3 = vcmask 7168  }
0x10f2   :  { %v1428_v32 = vpop.xlane.xlu0 %1427 }
0x10f3   :  { %v1429_v34 = vmul.f32 0.041666668, %v1428_v32  ;;  %v1001_v32 = vstv %s1856_s26 }
0x10f5   :  { %v1430_v42 = vsub.f32 %v1421_v16, %v1429_v34 }
0x10f7   :  { %v1431_v47 = vmul.f32 %v1430_v42, %v1430_v42 }
0x10f9   :  { %v1432_v48 = vsel %vm565_vm6, %v1431_v47, 0.0 }
0x114c   :  { %v1665_v37 = vpop.f32.mrb[36].mxu0 }
0x114d   :  { %v1666_v38 = vadd.f32 %v1888_v33, %v1665_v37  ;;  %v2069_v40 = vpop.f32.mrb[37].mxu0  ;;  %v1454_v33 = vstv %s1880_s28  ;;  %v1010_v37 = vmul.f32 %v1009_v29, %v999_v8 }
0x114e   :  { %v1668_v41 = vpop.f32.mrb[38].mxu0 }
0x114f   :  { %v2070_v43 = vpop.f32.mrb[39].mxu0  ;;  %v1671_v44 = vsel %vm565_vm6, %v1666_v38, 0.0  ;;  %v1002_v41 = vmul.f32 %v1001_v32, %v999_v8 }
0x1150   :  { %1672 = vadd.xlane.f32.xlu0 %v1671_v44  ;;  %v1695_v44 = vstv %s1894_s1 }
0x1154   :  { %748 = vadd.xlane.f32.xlu0 %v747_v46  ;;  %v1691_v46 = vstv %s1893_s2 }
0x1158   :  { %1433 = vadd.xlane.f32.xlu0 %v1432_v48 }
0x11dd   :  { %v1673_v52 = vpop.xlane.xlu0 %1672 }
0x11de   :  { %v1674_v53 = vmul.f32 0.041666668, %v1673_v52 }
0x11e0   :  { %v1675_v39 = vsub.f32 %v1666_v38, %v1674_v53 }
0x11e1   :  { %v749_v54 = vpop.xlane.xlu0 %748 }
0x11e2   :  { %v750_v55 = vmul.f32 0.041666668, %v749_v54  ;;  %v1676_v56 = vmul.f32 %v1675_v39, %v1675_v39 }
0x11e4   :  { %v751_v57 = vadd.f32 1e-05, %v750_v55  ;;  %v1677_v58 = vsel %vm565_vm6, %v1676_v56, 0.0 }
0x11e5   :  { %1678 = vadd.xlane.f32.xlu1 %v1677_v58  ;;  %v1434_v59 = vpop.xlane.xlu0 %1433 }
0x11e6   :  { %2195 = vrsqrt.f32 %v751_v57  ;;  %v1435_v60 = vmul.f32 0.041666668, %v1434_v59 }
0x11e8   :  { %v1436_v62 = vadd.f32 1e-05, %v1435_v60 }
0x11ea   :  { %2197 = vrsqrt.f32 %v1436_v62 }
0x11f0   :  { %v2196_v2 = vpop.eup %2195 }
0x11f1   :  { %v753_v5 = vmul.f32 %v2196_v2, %v745_v36 }
0x11f3   :  { %v760_v7 = vmul.f32 %v1843_v0, %v753_v5 }
0x11f4   :  { %v2198_v9 = vpop.eup %2197 }
0x11f5   :  { %v1438_v12 = vmul.f32 %v2198_v9, %v1430_v42  ;;  %v767_v13 = vadd.f32 %v1844_v4, %v760_v7 }
0x11f7   :  { %v1445_v16 = vmul.f32 %v1878_v10, %v1438_v12  ;;  %v774_v35 = vmul.f32 %v773_v11, %v767_v13  ;;  %v778_v6 = vmul.f32 %v777_v28, %v767_v13  ;;  %v770_v34 = vmul.f32 %v769_v18, %v767_v13  ;;  %v1896_v13 = vld [vmem:[%s2891_s16] ss:$0 sm:$0xff] }
0x11f9   :  { %v1452_v21 = vadd.f32 %v1879_v15, %v1445_v16  ;;  %v1007_v23 = vadd.f32 %v1006_v17, %v774_v35  ;;  %v1011_v43 = vadd.f32 %v1010_v37, %v778_v6  ;;  %v1003_v48 = vadd.f32 %v1002_v41, %v770_v34 }
0x11fb   :  { %v1459_v24 = vmul.f32 %v1458_v19, %v1452_v21  ;;  %v1463_v38 = vmul.f32 %v1462_v30, %v1452_v21  ;;  %v1455_v42 = vmul.f32 %v1454_v33, %v1452_v21 }
0x11fd   :  { %v1460_v25 = vadd.f32 %v1459_v24, %v1007_v23  ;;  %v1464_v49 = vadd.f32 %v1463_v38, %v1011_v43  ;;  %v1456_v50 = vadd.f32 %v1455_v42, %v1003_v48 }
0x1272   :  { %v1679_v20 = vpop.xlane.xlu1 %1678 }
0x1273   :  { %v1680_v22 = vmul.f32 0.041666668, %v1679_v20 }
0x1275   :  { %v1681_v27 = vadd.f32 1e-05, %v1680_v22 }
0x1277   :  { %2199 = vrsqrt.f32 %v1681_v27 }
0x1281   :  { %v2200_v31 = vpop.eup %2199 }
0x1282   :  { %v1683_v36 = vmul.f32 %v2200_v31, %v1675_v39 }
0x1284   :  { %v1684_v40 = vmul.f32 %v1878_v10, %v1683_v36 }
0x1286   :  { %v1685_v47 = vadd.f32 %v1879_v15, %v1684_v40 }
0x1288   :  { %v1696_v26 = vmul.f32 %v1695_v44, %v1685_v47  ;;  %v1688_v52 = vmul.f32 %v1687_v45, %v1685_v47  ;;  %v1692_v53 = vmul.f32 %v1691_v46, %v1685_v47 }
0x128a   :  { %v1697_v54 = vadd.f32 %v1696_v26, %v1464_v49  ;;  %v1689_v39 = vadd.f32 %v1688_v52, %v1456_v50  ;;  %v1693_v55 = vadd.f32 %v1692_v53, %v1460_v25 }
0x128c   :  { %1705 = vrot.lane.b32.xlu1 %v1697_v54, %s2307_s10  ;;  %1699 = vrot.lane.b32.xlu0 %v1689_v39, %s2308_s11 }
0x12fe   :  { %v1706_v56 = vpop.permute.xlu1 %1705  ;;  %v1700_v57 = vpop.permute.xlu0 %1699 }
0x12ff   :  { %v1703_v58 = vsel %vm1702_vm3, 0.0, %v1700_v57  ;;  %v1709_v60 = vsel %vm1486_vm0, %v1706_v56, 0.0 }
0x1300   :  { %v1710_v59 = vadd.f32 %v1703_v58, %v1693_v55 }
0x1302   :  { %v1711_v62 = vadd.f32 %v1710_v59, %v1709_v60 }
0x1304   :  { %v1714_v63 = vadd.f32 %v1713_v61, %v1711_v62 }
0x1306   :  { %v1717_v0 = vsel %vm565_vm6, %v1714_v63, 0.0 }
0x1307   :  { %1718 = vadd.xlane.f32.xlu1 %v1717_v0 }
0x1394   :  { %v1719_v1 = vpop.xlane.xlu1 %1718 }
0x1395   :  { %v1720_v2 = vmul.f32 0.041666668, %v1719_v1 }
0x1397   :  { %v1721_v4 = vsub.f32 %v1714_v63, %v1720_v2 }
0x1399   :  { %v1722_v5 = vmul.f32 %v1721_v4, %v1721_v4 }
0x139b   :  { %v1723_v7 = vsel %vm565_vm6, %v1722_v5, 0.0 }
0x139c   :  { %1724 = vadd.xlane.f32.xlu0 %v1723_v7 }
0x1429   :  { %v1725_v8 = vpop.xlane.xlu0 %1724 }
0x142a   :  { %v1726_v9 = vmul.f32 0.041666668, %v1725_v8 }
0x142c   :  { %v1727_v10 = vadd.f32 1e-05, %v1726_v9 }
0x142e   :  { %2201 = vrsqrt.f32 %v1727_v10 }
0x1438   :  { %v2202_v11 = vpop.eup %2201 }
0x1439   :  { %v1729_v12 = vmul.f32 %v2202_v11, %v1721_v4 }
0x143b   :  { %v1736_v15 = vmul.f32 %v1895_v51, %v1729_v12 }
0x143d   :  { %v1743_v16 = vadd.f32 %v1896_v13, %v1736_v15 }
0x143f   :  { %v1744_v35 = vmul.f32 %v1743_v16, %v2599_v14 }
0x1441   :  { %v1745_v17 = vadd.f32 %v1744_v35, %v2593_v3 }
0x1443   :  { %1747 = vrot.lane.b32.xlu0 %v1745_v17, %s2302_s25 }
0x14b5   :  { %v1748_v19 = vpop.permute.xlu0 %1747 }
0x14b6   :  { %v1750_v21 = vsel %vm458_vm4, %v1748_v19, 0.0 }
0x14b7   :  { %1751 = vst [vmem:[#allocation16] sm:$0xff] %v1750_v21 }
0x14b8   :  { %2226 = shalt.err (!%p2223_p9)
}
0x14b9   :  { %s2227_s9 = scalar_lea.hbm %s2588_s24, 128 }
0x14ba   :  { %p2228_p10 = scmp.ne.s32.totalorder %s2588_s24, %s2227_s9  ;;  %p2231_p11 = scmp.lt.u32.totalorder %s2227_s9, %s2588_s24 }
0x14bc   :  { %p2233_p12 = pnand %p2231_p11, %p2228_p10 }
0x14be   :  { %2236 = shalt.err (!%p2233_p12)
}
0x14bf   :  { %1761 = dma.vmem_to_hbm [thread:$0]  %s1759_s0, 128, %s2588_s24, [#allocation14]  }
0x14c0   :  { %2239 = dma.done.wait [#allocation14], 128  }
0x14c1   :  { %2240 = vsyncadd [#allocation14], 4294967168 }
0x14c2   :  { %1765 = vsyncpa [#allocation14], 1 }
0x14c3   :  { %1766 = vsyncpa [#allocation15], 1 }

</bundles_post_ra>
